<compile_context>
chip_gen: v7x
topology: tpu7x:2x2x1
jax: 0.10.0
libtpu: 0.0.40
codegen_flags: <defaults>
</compile_context>

<pallas_src>
import functools

import numpy as np
import jax
import jax.numpy as jnp
from jax.experimental import pallas as pl
from jax.experimental.pallas import tpu as pltpu

SR = 44100
N_FFT = 2048
HOP = 512
F_MIN = 27.5
F_MAX = 16000.0
N_MELS = 80
N_FREQS = N_FFT // 2 + 1          # 1025 one-sided bins
FREQ_TILE = 256                   # frequency bins per grid step (fills 256-wide MXU)
N_MELS_PAD = 128                  # lane-dense mel axis


def _round_up(a, b):
    return (a + b - 1) // b * b


def _hz_to_mel(f):
    return 2595.0 * np.log10(1.0 + np.asarray(f, np.float64) / 700.0)


def _mel_to_hz(m):
    return 700.0 * (10.0 ** (np.asarray(m, np.float64) / 2595.0) - 1.0)


# ----------------------------------------------------------------------------
# Deterministic "parameter" construction (mel filterbank + fused windowed DFT
# bases), truncated to the frequency range that touches a mel filter.
# ----------------------------------------------------------------------------
@functools.lru_cache(maxsize=1)
def _build_constants():
    # Mirrors torchaudio.functional.melscale_fbanks(norm=None, mel_scale="htk").
    all_freqs = np.linspace(0.0, SR // 2, N_FREQS)
    m_pts = np.linspace(_hz_to_mel(F_MIN), _hz_to_mel(F_MAX), N_MELS + 2)
    f_pts = _mel_to_hz(m_pts)
    f_diff = f_pts[1:] - f_pts[:-1]
    slopes = f_pts[None, :] - all_freqs[:, None]            # (N_FREQS, N_MELS+2)
    down = -slopes[:, :-2] / f_diff[:-1]
    up = slopes[:, 2:] / f_diff[1:]
    fb = np.maximum(0.0, np.minimum(down, up)).astype(np.float32)  # (N_FREQS, N_MELS)

    # Truncate: rows above f_max are identically zero -> drop them (bit-exact).
    n_used = int(np.nonzero(fb.any(axis=1))[0][-1]) + 1            # ~744
    n_freq_pad = max(FREQ_TILE, _round_up(n_used, FREQ_TILE))      # 768 -> 3 tiles
    n_tiles = n_freq_pad // FREQ_TILE

    fb_pad = np.zeros((n_freq_pad, N_MELS_PAD), np.float32)
    fb_pad[:n_used, :N_MELS] = fb[:n_used]

    # Hann (periodic) window folded into the one-sided real-DFT cos/sin bases,
    # fused per frequency tile as [cos(tile) | -sin(tile)] -> one N=512 matmul.
    n = np.arange(N_FFT)
    window = 0.5 * (1.0 - np.cos(2.0 * np.pi * n / N_FFT))
    f = np.arange(n_freq_pad)
    ang = 2.0 * np.pi * np.outer(n, f) / N_FFT              # (N_FFT, n_freq_pad)
    wc = window[:, None] * np.cos(ang)
    ws = -window[:, None] * np.sin(ang)
    wcs = np.empty((N_FFT, n_tiles * 2 * FREQ_TILE), np.float32)
    for ti in range(n_tiles):
        lo, hi = ti * FREQ_TILE, (ti + 1) * FREQ_TILE
        base = ti * 2 * FREQ_TILE
        wcs[:, base:base + FREQ_TILE] = wc[:, lo:hi]
        wcs[:, base + FREQ_TILE:base + 2 * FREQ_TILE] = ws[:, lo:hi]

    return n_tiles, jnp.asarray(wcs, jnp.bfloat16), jnp.asarray(fb_pad)


# ----------------------------------------------------------------------------
# Pallas kernel: per (frame-tile, freq-tile) fused DFT-power matmul + mel
# accumulation directly into the resident output block; finalize with log +
# per-frame (over the first 80 mel lanes) mean / unbiased-std normalization.
# ----------------------------------------------------------------------------
def mel_transform_kernel(frames_ref, wcs_ref, fb_ref, out_ref):
    k = pl.program_id(1)

    @pl.when(k == 0)
    def _():
        out_ref[...] = jnp.zeros_like(out_ref)

    # (FT, N_FFT)bf16 @ (N_FFT, 2*FREQ_TILE)bf16 -> (FT, 2*FREQ_TILE) f32
    reim = jnp.dot(frames_ref[...], wcs_ref[...],
                   preferred_element_type=jnp.float32)
    re = reim[:, :FREQ_TILE]
    im = reim[:, FREQ_TILE:]
    power = re * re + im * im                                # (FT, FREQ_TILE) f32
    out_ref[...] += jnp.dot(power, fb_ref[...],
                            preferred_element_type=jnp.float32)  # (FT, N_MELS_PAD)

    @pl.when(k == pl.num_programs(1) - 1)
    def _():
        logmel = jnp.log(out_ref[...])
        lane = jax.lax.broadcasted_iota(jnp.int32, logmel.shape, 1)
        mask = lane < N_MELS
        lm = jnp.where(mask, logmel, 0.0)
        mean = jnp.sum(lm, axis=1, keepdims=True) / N_MELS
        d = jnp.where(mask, logmel - mean, 0.0)
        # torch.std default is unbiased (divide by N-1)
        var = jnp.sum(d * d, axis=1, keepdims=True) / (N_MELS - 1)
        out_ref[...] = (logmel - mean) / jnp.sqrt(var)


def transform(x, frame_tile=256):
    """x: (1, time) float32 waveform -> (1, n_mels, n_frames) normalized log-mel."""
    assert x.shape[0] == 1  # reference normalization broadcast only valid for batch==1
    wav = x[0].astype(jnp.float32)
    t = wav.shape[0]
    n_frames = 1 + t // HOP
    pad = N_FFT // 2
    wav_p = jnp.pad(wav, (pad, pad), mode="reflect")         # center=True, reflect pad

    # Gather-free framing: HOP divides N_FFT, so every frame is 4 consecutive
    # hop-sized blocks -> reshape + 4 static slices + concat.
    n_blocks = n_frames + N_FFT // HOP - 1
    blocks = wav_p[: n_blocks * HOP].reshape(n_blocks, HOP)
    frames = jnp.concatenate(
        [blocks[j:j + n_frames] for j in range(N_FFT // HOP)], axis=1
    )                                                        # (n_frames, N_FFT)

    ft = frame_tile if n_frames >= frame_tile else _round_up(n_frames, 8)
    n_frames_pad = _round_up(n_frames, ft)
    frames = jnp.pad(frames, ((0, n_frames_pad - n_frames), (0, 0)))
    frames = frames.astype(jnp.bfloat16)

    n_tiles, wcs, fb = _build_constants()

    out = pl.pallas_call(
        mel_transform_kernel,
        out_shape=jax.ShapeDtypeStruct((n_frames_pad, N_MELS_PAD), jnp.float32),
        grid_spec=pltpu.PrefetchScalarGridSpec(
            num_scalar_prefetch=0,
            grid=(n_frames_pad // ft, n_tiles),
            in_specs=[
                pl.BlockSpec((ft, N_FFT), lambda i, k: (i, 0)),
                pl.BlockSpec((N_FFT, 2 * FREQ_TILE), lambda i, k: (0, k)),
                pl.BlockSpec((FREQ_TILE, N_MELS_PAD), lambda i, k: (k, 0)),
            ],
            out_specs=pl.BlockSpec((ft, N_MELS_PAD), lambda i, k: (i, 0)),
        ),
        compiler_params=pltpu.CompilerParams(
            dimension_semantics=("parallel", "arbitrary"),
            vmem_limit_bytes=32 << 20,
        ),
    )(frames, wcs, fb)

    # Drop frame/mel padding, back to torchaudio layout: (batch, n_mels, time_frames)
    return out[:n_frames, :N_MELS].T[None]


if __name__ == "__main__":
    key = jax.random.PRNGKey(0)
    x = jax.random.normal(key, (1, 4096), dtype=jnp.float32)   # (batch=1, time)
    y = transform(x)
    jax.block_until_ready(y)
    assert y.shape == (1, N_MELS, 1 + 4096 // HOP)
    assert bool(jnp.all(jnp.isfinite(y)))
    print("KERNEL_OK")
</pallas_src>

<mosaic_0001>
module attributes {stable_mosaic.version = 11 : i64} {
  func.func @mel_transform_kernel(%arg0: i32, %arg1: i32, %arg2: memref<16x2048xbf16, #tpu.memory_space<vmem>>, %arg3: memref<2048x512xbf16, #tpu.memory_space<vmem>>, %arg4: memref<256x128xf32, #tpu.memory_space<vmem>>, %arg5: memref<16x128xf32, #tpu.memory_space<vmem>>) attributes {dimension_semantics = [#tpu.dimension_semantics<parallel>, #tpu.dimension_semantics<arbitrary>], iteration_bounds = array<i64: 1, 3>, scalar_prefetch = 0 : i64, scratch_operands = 0 : i64, tpu.core_type = #tpu.core_type<tc>, window_params = [{transform_indices = @transform_0, window_bounds = array<i64: 16, 2048>}, {transform_indices = @transform_1, window_bounds = array<i64: 2048, 512>}, {transform_indices = @transform_2, window_bounds = array<i64: 256, 128>}, {transform_indices = @transform_3, window_bounds = array<i64: 16, 128>}]} {
    %c0_i32 = arith.constant 0 : i32
    %0 = arith.cmpi eq, %arg1, %c0_i32 : i32
    %1 = arith.extui %0 : i1 to i32
    %c0_i32_0 = arith.constant 0 : i32
    %2 = arith.cmpi ne, %1, %c0_i32_0 : i32
    scf.if %2 {
      %cst_12 = arith.constant 0.000000e+00 : f32
      %19 = vector.broadcast %cst_12 : f32 to vector<16x128xf32>
      %c0_13 = arith.constant 0 : index
      %c0_14 = arith.constant 0 : index
      %20 = vector.load %arg5[%c0_13, %c0_14] : memref<16x128xf32, #tpu.memory_space<vmem>>, vector<16x128xf32>
      tpu.vector_store %arg5[%c0_13, %c0_14], %19 {strides = array<i32>} : memref<16x128xf32, #tpu.memory_space<vmem>>, vector<16x128xf32>,
    } else {
    }
    %c0 = arith.constant 0 : index
    %c0_1 = arith.constant 0 : index
    %3 = vector.load %arg2[%c0, %c0_1] : memref<16x2048xbf16, #tpu.memory_space<vmem>>, vector<16x2048xbf16>
    %c0_2 = arith.constant 0 : index
    %c0_3 = arith.constant 0 : index
    %4 = vector.load %arg3[%c0_2, %c0_3] : memref<2048x512xbf16, #tpu.memory_space<vmem>>, vector<2048x512xbf16>
    %cst = arith.constant dense<0.000000e+00> : vector<16x512xf32>
    %5 = tpu.matmul %3, %4, %cst {dimension_numbers = #tpu.dot_dimension_numbers<[1], [0], [0], [1], [0, 0, 1, 1], [], []>} : vector<16x2048xbf16>, vector<2048x512xbf16>, vector<16x512xf32> -> vector<16x512xf32>
    %6 = vector.extract_strided_slice %5 {offsets = [0, 0], sizes = [16, 256], strides = [1, 1]} : vector<16x512xf32> to vector<16x256xf32>
    %7 = vector.extract_strided_slice %5 {offsets = [0, 256], sizes = [16, 256], strides = [1, 1]} : vector<16x512xf32> to vector<16x256xf32>
    %8 = arith.mulf %6, %6 : vector<16x256xf32>
    %9 = arith.mulf %7, %7 : vector<16x256xf32>
    %10 = arith.addf %8, %9 : vector<16x256xf32>
    %c0_4 = arith.constant 0 : index
    %c0_5 = arith.constant 0 : index
    %11 = vector.load %arg5[%c0_4, %c0_5] : memref<16x128xf32, #tpu.memory_space<vmem>>, vector<16x128xf32>
    %c0_6 = arith.constant 0 : index
    %c0_7 = arith.constant 0 : index
    %12 = vector.load %arg4[%c0_6, %c0_7] : memref<256x128xf32, #tpu.memory_space<vmem>>, vector<256x128xf32>
    %cst_8 = arith.constant dense<0.000000e+00> : vector<16x128xf32>
    %13 = tpu.matmul %10, %12, %cst_8 {dimension_numbers = #tpu.dot_dimension_numbers<[1], [0], [0], [1], [0, 0, 1, 1], [], []>} : vector<16x256xf32>, vector<256x128xf32>, vector<16x128xf32> -> vector<16x128xf32>
    %14 = arith.addf %11, %13 : vector<16x128xf32>
    %c0_9 = arith.constant 0 : index
    %c0_10 = arith.constant 0 : index
    %15 = vector.load %arg5[%c0_9, %c0_10] : memref<16x128xf32, #tpu.memory_space<vmem>>, vector<16x128xf32>
    tpu.vector_store %arg5[%c0_9, %c0_10], %14 {strides = array<i32>} : memref<16x128xf32, #tpu.memory_space<vmem>>, vector<16x128xf32>,
    %c2_i32 = arith.constant 2 : i32
    %16 = arith.cmpi eq, %arg1, %c2_i32 : i32
    %17 = arith.extui %16 : i1 to i32
    %c0_i32_11 = arith.constant 0 : i32
    %18 = arith.cmpi ne, %17, %c0_i32_11 : i32
    scf.if %18 {
      %c0_12 = arith.constant 0 : index
      %c0_13 = arith.constant 0 : index
      %19 = vector.load %arg5[%c0_12, %c0_13] : memref<16x128xf32, #tpu.memory_space<vmem>>, vector<16x128xf32>
      %20 = math.log %19 : vector<16x128xf32>
      %21 = tpu.iota {dimensions = array<i32: 1>} : vector<16x128xi32>
      %c80_i32 = arith.constant 80 : i32
      %22 = vector.broadcast %c80_i32 : i32 to vector<16x128xi32>
      %23 = arith.cmpi slt, %21, %22 : vector<16x128xi32>
      %cst_14 = arith.constant 0.000000e+00 : f32
      %24 = vector.broadcast %cst_14 : f32 to vector<16x128xf32>
      %25 = arith.select %23, %20, %24 : vector<16x128xi1>, vector<16x128xf32>
      %cst_15 = arith.constant dense<0.000000e+00> : vector<16xf32>
      %26 = vector.multi_reduction <add>, %25, %cst_15 [1] : vector<16x128xf32> to vector<16xf32>
      %27 = vector.shape_cast %26 : vector<16xf32> to vector<16x1xf32>
      %cst_16 = arith.constant 8.000000e+01 : f32
      %28 = vector.broadcast %cst_16 : f32 to vector<16x1xf32>
      %29 = arith.divf %27, %28 : vector<16x1xf32>
      %30 = vector.broadcast %29 : vector<16x1xf32> to vector<16x128xf32>
      %31 = arith.subf %20, %30 : vector<16x128xf32>
      %cst_17 = arith.constant 0.000000e+00 : f32
      %32 = vector.broadcast %cst_17 : f32 to vector<16x128xf32>
      %33 = arith.select %23, %31, %32 : vector<16x128xi1>, vector<16x128xf32>
      %34 = arith.mulf %33, %33 : vector<16x128xf32>
      %cst_18 = arith.constant dense<0.000000e+00> : vector<16xf32>
      %35 = vector.multi_reduction <add>, %34, %cst_18 [1] : vector<16x128xf32> to vector<16xf32>
      %36 = vector.shape_cast %35 : vector<16xf32> to vector<16x1xf32>
      %cst_19 = arith.constant 7.900000e+01 : f32
      %37 = vector.broadcast %cst_19 : f32 to vector<16x1xf32>
      %38 = arith.divf %36, %37 : vector<16x1xf32>
      %39 = vector.broadcast %29 : vector<16x1xf32> to vector<16x128xf32>
      %40 = arith.subf %20, %39 : vector<16x128xf32>
      %41 = math.sqrt %38 : vector<16x1xf32>
      %42 = vector.broadcast %41 : vector<16x1xf32> to vector<16x128xf32>
      %43 = arith.divf %40, %42 : vector<16x128xf32>
      %c0_20 = arith.constant 0 : index
      %c0_21 = arith.constant 0 : index
      %44 = vector.load %arg5[%c0_20, %c0_21] : memref<16x128xf32, #tpu.memory_space<vmem>>, vector<16x128xf32>
      tpu.vector_store %arg5[%c0_20, %c0_21], %43 {strides = array<i32>} : memref<16x128xf32, #tpu.memory_space<vmem>>, vector<16x128xf32>,
    } else {
    }
    return
  }
  func.func @transform_0(%arg0: i32, %arg1: i32) -> (i32, i32) {
    %c0_i32 = arith.constant 0 : i32
    %c0_i32_0 = arith.constant 0 : i32
    return %arg0, %c0_i32 : i32, i32
  }
  func.func @transform_1(%arg0: i32, %arg1: i32) -> (i32, i32) {
    %c0_i32 = arith.constant 0 : i32
    %c0_i32_0 = arith.constant 0 : i32
    return %c0_i32, %arg1 : i32, i32
  }
  func.func @transform_2(%arg0: i32, %arg1: i32) -> (i32, i32) {
    %c0_i32 = arith.constant 0 : i32
    %c0_i32_0 = arith.constant 0 : i32
    return %arg1, %c0_i32 : i32, i32
  }
  func.func @transform_3(%arg0: i32, %arg1: i32) -> (i32, i32) {
    %c0_i32 = arith.constant 0 : i32
    %c0_i32_0 = arith.constant 0 : i32
    return %arg0, %c0_i32 : i32, i32
  }
}

</mosaic_0001>

<bundles_post_ra>
// kernel: tpu_custom_call.1
= control target key start
LH: loop header
LB: loop body
LE: loop exit
PB: predicated region body
PF: predicated region fallthrough
CT: control target
= control target key end

     0   :  { %8 = vsyncpa [#allocation3], 0  ;;  %s7009_s0 = inlined_call_operand.hbm [shape: bf16[16,2048], index: 0, kind: input, shape index: {}]   ;;  %s7010_s1 = inlined_call_operand.hbm [shape: bf16[2048,1536], index: 1, kind: input, shape index: {}]   ;;  %s7011_s2 = inlined_call_operand.hbm [shape: f32[768,128], index: 2, kind: input, shape index: {}]   ;;  %s7012_s3 = inlined_call_operand.hbm [shape: f32[16,128], index: 3, kind: output, shape index: {}]  }
   0x1   :  { %9 = vsyncpa [#allocation6], 0 }
   0x2   :  { %11 = vsyncpa [#allocation6 + $0x1], 0 }
   0x3   :  { %12 = vsyncpa [#allocation4], 0  ;;  %s6176_s12 = smov 0   ;;  %s6178_s13 = smov 0  }
   0x4   :  { %s6180_s14 = smov 0   ;;  %s6182_s15 = smov 0  }
   0x5   :  { %s6184_s16 = smov 0   ;;  %s6186_s17 = smov 0  }
   0x6 LB: > { %s27_s18 = sadd.s32 1, %s6136_s16  ;;  %s63_s19 = sadd.s32 1, %s6128_s14  ;;  %s6140_s17 = sphi %s6186_s17, %s18_s17   ;;  %s6136_s16 = sphi %s6184_s16, %s7034_s16   ;;  %s6132_s15 = sphi %s6182_s15, %s7033_s15   ;;  %s6128_s14 = sphi %s6180_s14, %s7032_s14   ;;  %s6124_s13 = sphi %s6178_s13, %s7031_s13   ;;  %s6120_s12 = sphi %s6176_s12, %s7030_s12  }
   0x7   : > { %p28_p0 = scmp.ge.s32.totalorder %s27_s18, 3  ;;  %p70_p1 = scmp.ne.s32.totalorder %s6128_s14, %s6124_s13 }
   0x8   : > { %p71_p2 = scmp.eq.s32.totalorder %s6140_s17, 0  ;;  %p5124_p4 = scmp.lt.s32.totalorder %s6140_s17, 3 }
   0x9   : > { %s7036_s18 = smov (%p28_p0, %s27_s18), 0  ;;  %s169_s21 = sand.u32 1, %s6140_s17  }
   0xa   : > { %p72_p3 = por %p71_p2, %p70_p1  ;;  %s60_s20 = ssub.s32 %s6136_s16, %s7036_s18 }
   0xb   : > { %p61_p5 = scmp.eq.s32.totalorder %s60_s20, 0  ;;  %s171_s22 = sand.u32 1, %s6128_s14  }
   0xc   : > { %s4956_s23 = sshll.u32 %s6136_s16, 8  ;;  %s4412_s25 = sshll.u32 %s171_s22, 12 }
   0xd   : > { %s6220_s24 = scalar_select %p61_p5, %s6128_s14, %s63_s19  }
   0xe   : > { %s6227_s28 = scalar_lea.hbm %s7010_s1, %s4956_s23  ;;  %p6229_p6 = pnand %p5124_p4, %p72_p3 }
   0xf   : > { %s173_s30 = scalar_lea.vmem [#allocation5], %s4412_s25  ;;  %s6235_s5 = scalar_lea.sflag [#allocation6], %s169_s21 }
  0x10   : > { %s7019_s29 = scalar_select %p6229_p6, 1, 0 }
  0x11   : > { %s180_s4 = sshll.u32 %s173_s30, 4  ;;  %s5968_s6 = scalar_lea.hbm %s6227_s28, 65536  ;;  %s6233_s4 = int_to_ptr.vmem [resolvable:$true] %s180_s4 }
  0x12   : > { %p5969_p7 = scmp.ne.s32.totalorder %s6227_s28, %s5968_s6  ;;  %p7014_p8 = pneg %p6229_p6 }
  0x13   : > { %s5973_s9 = scalar_lea.hbm %s7010_s1, 196608  ;;  %p5974_p11 = scmp.lt.u32.totalorder %s6227_s28, %s7010_s1 }
  0x14   : > { %p5971_p9 = pnand %p7014_p8, %p5969_p7  ;;  %p5975_p12 = scmp.lt.u32.totalorder %s5973_s9, %s5968_s6 }
  0x15   : > { %p5977_p0 = scmp.lt.u32.totalorder %s5968_s6, %s6227_s28 }
  0x16   : > { %p5972_p10 = pneg %p5971_p9  ;;  %p5976_p13 = por %p5975_p12, %p5974_p11 }
  0x18   : > { %p5978_p1 = por %p5977_p0, %p5976_p13 }
  0x1a   : > { %p5979_p2 = pnand %p5978_p1, %p5972_p10 }
  0x1c   : > { %5982 = shalt.err (!%p5979_p2)
}
  0x1d   : > { %s5983_s19 = scalar_lea.vmem %s6233_s4, 65536  ;;  %s6142_s20 = smov [#allocation5]  }
  0x1e   : > { %p5984_p3 = scmp.ne.s32.totalorder %s6233_s4, %s5983_s19  ;;  %s5988_s21 = sshll.u32 %s6142_s20, 4  ;;  %s5989_s21 = int_to_ptr.vmem [resolvable:$false] %s5988_s21 }
  0x1f   : > { %s5990_s23 = scalar_lea.vmem %s5989_s21, 131072  ;;  %p5991_p7 = scmp.lt.s32.totalorder %s6233_s4, %s5989_s21 }
  0x20   : > { %p5986_p4 = pnand %p5984_p3, %p7014_p8  ;;  %p5992_p9 = scmp.lt.s32.totalorder %s5990_s23, %s5983_s19 }
  0x22   : > { %p5987_p5 = pneg %p5986_p4  ;;  %p5993_p11 = por %p5992_p9, %p5991_p7 }
  0x24   : > { %p5994_p12 = pnand %p5993_p11, %p5987_p5 }
  0x26   : > { %5997 = shalt.err (!%p5994_p12)
}
  0x27   : > { %s6143_s25 = smov 768   ;;  %s6144_s26 = smov 256  }
  0x28   : > { %s6145_s27 = smov 16   ;;  %s6264_s30 = sadd.s32 4294967295, %s6140_s17  }
  0x29   : > { %5119 = dma.hbm_to_vmem [thread:$0]  (!%p6229_p6), %s6227_s28, 65536, %s6233_s4, %s6235_s5, %s6143_s25, %s6144_s26, %s6145_s27  }
  0x2a   : > { %p76_p10 = scmp.ne.s32.totalorder %s6124_s13, %s6120_s12  ;;  %p7013_p13 = scmp.eq.s32.totalorder %s6264_s30, 0 }
  0x2b   : > { %p4409_p0 = scmp.ge.s32.totalorder %s6140_s17, 1  ;;  %p139_p1 = scmp.lt.s32.totalorder %s6140_s17, 4 }
  0x2c   : > { %p6273_p2 = por %p7013_p13, %p76_p10  ;;  %s6146_s28 = smov [#allocation2]  }
  0x2d   : > { %p6277_p3 = pnand %p4409_p0, %p139_p1  ;;  %s155_s4 = sshll.u32 %s6146_s28, 4  ;;  %s6281_s4 = int_to_ptr.vmem [resolvable:$true] %s155_s4 }
  0x2e   : > { %s7020_s6 = scalar_select %p6273_p2, 1, 0 }
  0x2f   : > { %s7021_s7 = scalar_select %p6277_p3, 1, 0 }
  0x30   : > { %p5112_p4 = pneg %p6277_p3  ;;  %s4415_s12 = sshll.u32 %s171_s22, 8 }
  0x31   : > { %s4957_s8 = sshll.u32 %s6136_s16, 12  ;;  %s194_s20 = scalar_lea.vmem [#allocation7], %s4415_s12 }
  0x32   : > { %p6290_p5 = pnand %p5112_p4, %p7013_p13  ;;  %s6297_s19 = scalar_lea.hbm %s7011_s2, %s4957_s8 }
  0x33   : > { %s201_s21 = sshll.u32 %s194_s20, 4  ;;  %s5998_s22 = scalar_lea.hbm %s7009_s0, 2048  ;;  %s6299_s21 = int_to_ptr.vmem [resolvable:$true] %s201_s21 }
  0x34   : > { %p5999_p7 = scmp.ne.s32.totalorder %s7009_s0, %s5998_s22  ;;  %p6000_p9 = pneg %p6290_p5 }
  0x35   : > { %p6005_p10 = scmp.lt.u32.totalorder %s5998_s22, %s7009_s0 }
  0x36   : > { %p6001_p11 = pnand %p6000_p9, %p5999_p7 }
  0x38   : > { %p6002_p12 = pneg %p6001_p11 }
  0x3a   : > { %p6007_p0 = pnand %p6005_p10, %p6002_p12 }
  0x3c   : > { %6010 = shalt.err (!%p6007_p0)
}
  0x3d   : > { %s6011_s12 = scalar_lea.vmem %s6281_s4, 2048  ;;  %p6019_p8 = scmp.lt.s32.totalorder %s6281_s4, %s6281_s4 }
  0x3e   : > { %p6012_p1 = scmp.ne.s32.totalorder %s6281_s4, %s6011_s12  ;;  %p6020_p2 = scmp.lt.s32.totalorder %s6011_s12, %s6011_s12 }
  0x40   : > { %p6014_p4 = pnand %p6012_p1, %p6000_p9  ;;  %p6021_p3 = por %p6020_p2, %p6019_p8 }
  0x42   : > { %p6015_p13 = pneg %p6014_p4 }
  0x44   : > { %p6022_p6 = pnand %p6021_p3, %p6015_p13 }
  0x46   : > { %6025 = shalt.err (!%p6022_p6)
}
  0x47   : > { %s6147_s8 = smov 1024   ;;  %s6148_s11 = smov 64  }
  0x48   : > { %5115 = dma.hbm_to_vmem [thread:$0]  (!%p6290_p5), %s7009_s0, 2048, %s6281_s4, [#allocation3], %s6147_s8, %s6147_s8, %s6148_s11  }
  0x49   : > { %s6026_s25 = scalar_lea.hbm %s6297_s19, 4096  ;;  %p7023_p9 = scmp.ne.s32.totalorder %s7019_s29, 0 }
  0x4a   : > { %p6027_p7 = scmp.ne.s32.totalorder %s6297_s19, %s6026_s25  ;;  %s6031_s27 = scalar_lea.hbm %s7011_s2, 12288 }
  0x4b   : > { %p7024_p8 = pneg %p7023_p9  ;;  %p6032_p2 = scmp.lt.u32.totalorder %s6297_s19, %s7011_s2 }
  0x4c   : > { %p6033_p3 = scmp.lt.u32.totalorder %s6031_s27, %s6026_s25  ;;  %p6035_p12 = scmp.lt.u32.totalorder %s6026_s25, %s6297_s19 }
  0x4d   : > { %p6029_p13 = pnand %p6027_p7, %p7024_p8 }
  0x4e   : > { %p6034_p11 = por %p6033_p3, %p6032_p2 }
  0x4f   : > { %p6030_p6 = pneg %p6029_p13 }
  0x50   : > { %p6036_p10 = por %p6035_p12, %p6034_p11 }
  0x52   : > { %p6037_p0 = pnand %p6036_p10, %p6030_p6 }
  0x54   : > { %6040 = shalt.err (!%p6037_p0)
}
  0x55   : > { %s6041_s4 = scalar_lea.vmem %s6299_s21, 4096  ;;  %p7025_p1 = pmov %p7024_p8 }
  0x56   : > { %p6042_p5 = scmp.ne.s32.totalorder %s6299_s21, %s6041_s4  ;;  %s6149_s9 = smov [#allocation7]  }
  0x57   : > { %s6046_s12 = sshll.u32 %s6149_s9, 4  ;;  %s6047_s12 = int_to_ptr.vmem [resolvable:$false] %s6046_s12 }
  0x58   : > { %p6044_p4 = pnand %p6042_p5, %p7025_p1  ;;  %s6048_s8 = scalar_lea.vmem %s6047_s12, 8192 }
  0x59   : > { %p6049_p8 = scmp.lt.s32.totalorder %s6299_s21, %s6047_s12  ;;  %p6050_p13 = scmp.lt.s32.totalorder %s6048_s8, %s6041_s4 }
  0x5a   : > { %p6045_p7 = pneg %p6044_p4 }
  0x5b   : > { %p6051_p2 = por %p6050_p13, %p6049_p8 }
  0x5d   : > { %p6052_p3 = pnand %p6051_p2, %p6045_p7 }
  0x5f   : > { %6055 = shalt.err (!%p6052_p3)
}
  0x60   : > { %s6150_s11 = smov 128   ;;  %s6151_s20 = smov 8  }
  0x61   : > { %5122 = dma.hbm_to_vmem [thread:$0]  (!%p7023_p9), %s6297_s19, 4096, %s6299_s21, %s6235_s5, %s6150_s11, %s6150_s11, %s6151_s20  }
  0x62   : > { %p7026_p6 = scmp.ne.s32.totalorder %s7021_s7, 0 }
  0x63   : > { %p7027_p11 = scmp.eq.s32.totalorder (!%p7026_p6), %s6264_s30, 0 }
  0x64   : > { %213 = sbr.rel (%p7026_p6) target bundleno = 1444 (0x5a4), region = 32 }
  0x6b   : > { %6107 = dma.done.wait (%p7027_p11), [#allocation3], 2048   ;;  %p7028_p12 = pmov %p7027_p11 }
  0x6c   : > { %s219_s23 = sand.u32 1, %s6264_s30   ;;  %s221_s25 = sand.u32 1, %s6124_s13  }
  0x6d   : > { %6109 = vsyncadd (%p7028_p12), [#allocation3], 4294965248  ;;  %s4420_s22 = sshll.u32 %s221_s25, 12  ;;  %s220_s26 = scalar_lea.sflag [#allocation6], %s219_s23 }
  0x6e   : > { %s6354_s27 = scalar_lea.vmem [#allocation5], %s4420_s22  ;;  %p7029_p10 = scmp.ne.s32.totalorder %s7020_s6, 0 }
  0x70   : > { %6111 = dma.done.wait (%p7029_p10), %s220_s26, 69632  }
  0x71   : > { %6113 = vsyncadd (%p7029_p10), %s220_s26, 4294897664  ;;  %s4421_s29 = sshll.u32 %s221_s25, 8  ;;  %p4422_p9 = scmp.ne.s32.totalorder %s6132_s15, 0 }
  0x72   : > { %s6360_s5 = scalar_lea.vmem [#allocation7], %s4421_s29  ;;  %v6152_v0 = vmov (!%p4422_p9), 0.0  }
  0x73   : > { %262 = sbr.rel (%p4422_p9) target bundleno = 122 (0x7a), region = 48  ;;  %263 = vst [vmem:[#allocation8] sm:$0xff] (!%p4422_p9), %v6152_v0  ;;  %264 = vst [vmem:[#allocation8 + $0x8] sm:$0xff] (!%p4422_p9), %v6152_v0 }
  0x7a PF: > { %v5188_v1 = vld [vmem:[%s6354_s27 + $0x4] ss:$16 sps:$4 sm:$0xff]   ;;  %v5190_v2 = vld [vmem:[%s6354_s27 + $0xc] ss:$16 sps:$4 sm:$0xff]   ;;  %v5192_v3 = vld [vmem:[%s6354_s27] ss:$16 sps:$4 sm:$0xff]  }
  0x7b   : > { %3433 = vmatprep.subr.bf16.mxu0 %v5188_v1  ;;  %v5193_v4 = vld [vmem:[%s6354_s27 + $0x8] ss:$16 sps:$4 sm:$0xff]   ;;  %3777 = vmatprep.subr.bf16.mxu1 %v5190_v2  ;;  %v5194_v5 = vld [vmem:[%s6354_s27 + $0x24] ss:$16 sps:$4 sm:$0xff]   ;;  %v5196_v6 = vld [vmem:[%s6354_s27 + $0x2c] ss:$16 sps:$4 sm:$0xff]  }
  0x7c   : > { %3434 = vmatpush1.bf16.msra.mxu0 %v5192_v3  ;;  %3778 = vmatpush1.bf16.msra.mxu1 %v5193_v4  ;;  %v5198_v7 = vld [vmem:[%s6354_s27 + $0x20] ss:$16 sps:$4 sm:$0xff]   ;;  %v5199_v8 = vld [vmem:[%s6354_s27 + $0x28] ss:$16 sps:$4 sm:$0xff]   ;;  %v5200_v9 = vld [vmem:[%s6354_s27 + $0x44] ss:$16 sps:$4 sm:$0xff]  }
  0x7d   : > { %3435 = vmatprep.subr.bf16.mxu0 %v5194_v5  ;;  %3779 = vmatprep.subr.bf16.mxu1 %v5196_v6  ;;  %v5202_v10 = vld [vmem:[%s6354_s27 + $0x4c] ss:$16 sps:$4 sm:$0xff]   ;;  %v5204_v11 = vld [vmem:[%s6354_s27 + $0x40] ss:$16 sps:$4 sm:$0xff]   ;;  %v5205_v12 = vld [vmem:[%s6354_s27 + $0x48] ss:$16 sps:$4 sm:$0xff]  }
  0x7e   : > { %v5206_v13 = vld [vmem:[%s6354_s27 + $0x64] ss:$16 sps:$4 sm:$0xff]   ;;  %v5208_v14 = vld [vmem:[%s6354_s27 + $0x6c] ss:$16 sps:$4 sm:$0xff]   ;;  %v5210_v15 = vld [vmem:[%s6354_s27 + $0x60] ss:$16 sps:$4 sm:$0xff]  }
  0x7f   : > { %v5211_v16 = vld [vmem:[%s6354_s27 + $0x68] ss:$16 sps:$4 sm:$0xff]   ;;  %v5212_v17 = vld [vmem:[%s6354_s27 + $0x84] ss:$16 sps:$4 sm:$0xff]   ;;  %v5214_v18 = vld [vmem:[%s6354_s27 + $0x8c] ss:$16 sps:$4 sm:$0xff]  }
  0x80   : > { %3436 = vmatpush1.bf16.msra.mxu0 %v5198_v7  ;;  %3780 = vmatpush1.bf16.msra.mxu1 %v5199_v8  ;;  %v5216_v19 = vld [vmem:[%s6354_s27 + $0x80] ss:$16 sps:$4 sm:$0xff]   ;;  %v5217_v20 = vld [vmem:[%s6354_s27 + $0x88] ss:$16 sps:$4 sm:$0xff]   ;;  %v5218_v21 = vld [vmem:[%s6354_s27 + $0xa4] ss:$16 sps:$4 sm:$0xff]  }
  0x81   : > { %3437 = vmatprep.subr.bf16.mxu0 %v5200_v9  ;;  %3781 = vmatprep.subr.bf16.mxu1 %v5202_v10  ;;  %v5220_v22 = vld [vmem:[%s6354_s27 + $0xac] ss:$16 sps:$4 sm:$0xff]   ;;  %v5222_v23 = vld [vmem:[%s6354_s27 + $0xa0] ss:$16 sps:$4 sm:$0xff]   ;;  %v5223_v24 = vld [vmem:[%s6354_s27 + $0xa8] ss:$16 sps:$4 sm:$0xff]  }
  0x82   : > { %v5224_v25 = vld [vmem:[%s6354_s27 + $0xc4] ss:$16 sps:$4 sm:$0xff]   ;;  %v5226_v26 = vld [vmem:[%s6354_s27 + $0xcc] ss:$16 sps:$4 sm:$0xff]   ;;  %v5228_v27 = vld [vmem:[%s6354_s27 + $0xc0] ss:$16 sps:$4 sm:$0xff]  }
  0x83   : > { %v5229_v28 = vld [vmem:[%s6354_s27 + $0xc8] ss:$16 sps:$4 sm:$0xff]   ;;  %v5230_v29 = vld [vmem:[%s6354_s27 + $0xe4] ss:$16 sps:$4 sm:$0xff]   ;;  %v5232_v30 = vld [vmem:[%s6354_s27 + $0xec] ss:$16 sps:$4 sm:$0xff]  }
  0x84   : > { %3438 = vmatpush1.bf16.msra.mxu0 %v5204_v11  ;;  %3782 = vmatpush1.bf16.msra.mxu1 %v5205_v12  ;;  %v5234_v31 = vld [vmem:[%s6354_s27 + $0xe0] ss:$16 sps:$4 sm:$0xff]   ;;  %v5235_v32 = vld [vmem:[%s6354_s27 + $0xe8] ss:$16 sps:$4 sm:$0xff]   ;;  %v5236_v33 = vld [vmem:[%s6354_s27 + $0x104] ss:$16 sps:$4 sm:$0xff]  }
  0x85   : > { %3439 = vmatprep.subr.bf16.mxu0 %v5206_v13  ;;  %3783 = vmatprep.subr.bf16.mxu1 %v5208_v14  ;;  %v5238_v34 = vld [vmem:[%s6354_s27 + $0x10c] ss:$16 sps:$4 sm:$0xff]   ;;  %v5240_v35 = vld [vmem:[%s6354_s27 + $0x100] ss:$16 sps:$4 sm:$0xff]   ;;  %v5241_v36 = vld [vmem:[%s6354_s27 + $0x108] ss:$16 sps:$4 sm:$0xff]  }
  0x86   : > { %v5242_v37 = vld [vmem:[%s6354_s27 + $0x124] ss:$16 sps:$4 sm:$0xff]   ;;  %v5244_v38 = vld [vmem:[%s6354_s27 + $0x12c] ss:$16 sps:$4 sm:$0xff]   ;;  %v5246_v39 = vld [vmem:[%s6354_s27 + $0x120] ss:$16 sps:$4 sm:$0xff]  }
  0x87   : > { %v5247_v40 = vld [vmem:[%s6354_s27 + $0x128] ss:$16 sps:$4 sm:$0xff]   ;;  %v5248_v41 = vld [vmem:[%s6354_s27 + $0x144] ss:$16 sps:$4 sm:$0xff]   ;;  %v5250_v42 = vld [vmem:[%s6354_s27 + $0x14c] ss:$16 sps:$4 sm:$0xff]  }
  0x88   : > { %3440 = vmatpush1.bf16.msra.mxu0 %v5210_v15  ;;  %3784 = vmatpush1.bf16.msra.mxu1 %v5211_v16  ;;  %v5252_v43 = vld [vmem:[%s6354_s27 + $0x140] ss:$16 sps:$4 sm:$0xff]   ;;  %v5253_v44 = vld [vmem:[%s6354_s27 + $0x148] ss:$16 sps:$4 sm:$0xff]   ;;  %v5254_v45 = vld [vmem:[%s6354_s27 + $0x164] ss:$16 sps:$4 sm:$0xff]  }
  0x89   : > { %3441 = vmatprep.subr.bf16.mxu0 %v5212_v17  ;;  %3785 = vmatprep.subr.bf16.mxu1 %v5214_v18  ;;  %v5256_v46 = vld [vmem:[%s6354_s27 + $0x16c] ss:$16 sps:$4 sm:$0xff]   ;;  %v265_v47 = vld [vmem:[#allocation2] sm:$0xff]  ;;  %v5259_v50 = vld [vmem:[%s6354_s27 + $0x168] ss:$16 sps:$4 sm:$0xff]   ;;  %p4951_p0 = scmp.ne.s32.totalorder %s6132_s15, 2 }
  0x8a   : > { %v273_v48 = vld [vmem:[#allocation2 + $0x40] sm:$0xff]  ;;  %v5262_v53 = vld [vmem:[%s6354_s27 + $0x18c] ss:$16 sps:$4 sm:$0xff]   ;;  %v5265_v55 = vld [vmem:[%s6354_s27 + $0x188] ss:$16 sps:$4 sm:$0xff]  }
  0x8b   : > { %v5258_v49 = vld [vmem:[%s6354_s27 + $0x160] ss:$16 sps:$4 sm:$0xff]   ;;  %v4424_v51 = vcombine.high %v265_v47, %v273_v48  ;;  %v5260_v52 = vld [vmem:[%s6354_s27 + $0x184] ss:$16 sps:$4 sm:$0xff]   ;;  %v5268_v57 = vld [vmem:[%s6354_s27 + $0x1ac] ss:$16 sps:$4 sm:$0xff]   ;;  %v4423_v6 = vcombine.low %v265_v47, %v273_v48 }
  0x8c   : > { %3442 = vmatpush1.bf16.msra.mxu0 %v5216_v19  ;;  %3786 = vmatpush1.bf16.msra.mxu1 %v5217_v20  ;;  %v5264_v54 = vld [vmem:[%s6354_s27 + $0x180] ss:$16 sps:$4 sm:$0xff]   ;;  %v5266_v56 = vld [vmem:[%s6354_s27 + $0x1a4] ss:$16 sps:$4 sm:$0xff]   ;;  %v5271_v59 = vld [vmem:[%s6354_s27 + $0x1a8] ss:$16 sps:$4 sm:$0xff]  }
  0x8d   : > { %3443 = vmatprep.subr.bf16.mxu0 %v5218_v21  ;;  %3787 = vmatprep.subr.bf16.mxu1 %v5220_v22  ;;  %v5270_v58 = vld [vmem:[%s6354_s27 + $0x1a0] ss:$16 sps:$4 sm:$0xff]   ;;  %v5272_v60 = vld [vmem:[%s6354_s27 + $0x1c4] ss:$16 sps:$4 sm:$0xff]   ;;  %v5274_v61 = vld [vmem:[%s6354_s27 + $0x1cc] ss:$16 sps:$4 sm:$0xff]  }
  0x8e   : > { %3465 = vmatprep.mubr.bf16.mxu0 %v4424_v51  ;;  %3809 = vmatprep.mubr.bf16.mxu1 %v4424_v51  ;;  %v5276_v62 = vld [vmem:[%s6354_s27 + $0x1c0] ss:$16 sps:$4 sm:$0xff]   ;;  %v5277_v63 = vld [vmem:[%s6354_s27 + $0x1c8] ss:$16 sps:$4 sm:$0xff]   ;;  %v5278_v0 = vld [vmem:[%s6354_s27 + $0x1e4] ss:$16 sps:$4 sm:$0xff]  }
  0x8f   : > { %v5280_v1 = vld [vmem:[%s6354_s27 + $0x1ec] ss:$16 sps:$4 sm:$0xff]   ;;  %v5282_v2 = vld [vmem:[%s6354_s27 + $0x1e0] ss:$16 sps:$4 sm:$0xff]   ;;  %v5283_v3 = vld [vmem:[%s6354_s27 + $0x1e8] ss:$16 sps:$4 sm:$0xff]  }
  0x90   : > { %3444 = vmatpush1.bf16.msra.mxu0 %v5222_v23  ;;  %3788 = vmatpush1.bf16.msra.mxu1 %v5223_v24  ;;  %v5286_v4 = vld [vmem:[%s6354_s27 + $0x204] ss:$16 sps:$4 sm:$0xff]   ;;  %v5289_v5 = vld [vmem:[%s6354_s27 + $0x20c] ss:$16 sps:$4 sm:$0xff]   ;;  %v5284_v7 = vld [vmem:[%s6354_s27 + $0x200] ss:$16 sps:$4 sm:$0xff]  }
  0x91   : > { %3445 = vmatprep.subr.bf16.mxu0 %v5224_v25  ;;  %3789 = vmatprep.subr.bf16.mxu1 %v5226_v26  ;;  %v5287_v8 = vld [vmem:[%s6354_s27 + $0x208] ss:$16 sps:$4 sm:$0xff]   ;;  %v5292_v9 = vld [vmem:[%s6354_s27 + $0x224] ss:$16 sps:$4 sm:$0xff]   ;;  %v5295_v10 = vld [vmem:[%s6354_s27 + $0x22c] ss:$16 sps:$4 sm:$0xff]  }
  0x92   : > { %v5290_v11 = vld [vmem:[%s6354_s27 + $0x220] ss:$16 sps:$4 sm:$0xff]   ;;  %v5293_v12 = vld [vmem:[%s6354_s27 + $0x228] ss:$16 sps:$4 sm:$0xff]   ;;  %v5298_v13 = vld [vmem:[%s6354_s27 + $0x244] ss:$16 sps:$4 sm:$0xff]  }
  0x93   : > { %v5301_v14 = vld [vmem:[%s6354_s27 + $0x24c] ss:$16 sps:$4 sm:$0xff]   ;;  %v5296_v15 = vld [vmem:[%s6354_s27 + $0x240] ss:$16 sps:$4 sm:$0xff]   ;;  %v5299_v16 = vld [vmem:[%s6354_s27 + $0x248] ss:$16 sps:$4 sm:$0xff]  }
  0x94   : > { %3446 = vmatpush1.bf16.msra.mxu0 %v5228_v27  ;;  %3790 = vmatpush1.bf16.msra.mxu1 %v5229_v28  ;;  %v5304_v17 = vld [vmem:[%s6354_s27 + $0x264] ss:$16 sps:$4 sm:$0xff]   ;;  %v5307_v18 = vld [vmem:[%s6354_s27 + $0x26c] ss:$16 sps:$4 sm:$0xff]   ;;  %v5302_v19 = vld [vmem:[%s6354_s27 + $0x260] ss:$16 sps:$4 sm:$0xff]  }
  0x95   : > { %3447 = vmatprep.subr.bf16.mxu0 %v5230_v29  ;;  %3791 = vmatprep.subr.bf16.mxu1 %v5232_v30  ;;  %v5305_v20 = vld [vmem:[%s6354_s27 + $0x268] ss:$16 sps:$4 sm:$0xff]   ;;  %v5310_v21 = vld [vmem:[%s6354_s27 + $0x284] ss:$16 sps:$4 sm:$0xff]   ;;  %v5313_v22 = vld [vmem:[%s6354_s27 + $0x28c] ss:$16 sps:$4 sm:$0xff]  }
  0x96   : > { %v5308_v23 = vld [vmem:[%s6354_s27 + $0x280] ss:$16 sps:$4 sm:$0xff]   ;;  %v5311_v24 = vld [vmem:[%s6354_s27 + $0x288] ss:$16 sps:$4 sm:$0xff]   ;;  %v5316_v25 = vld [vmem:[%s6354_s27 + $0x2a4] ss:$16 sps:$4 sm:$0xff]  }
  0x97   : > { %v5319_v26 = vld [vmem:[%s6354_s27 + $0x2ac] ss:$16 sps:$4 sm:$0xff]   ;;  %v5314_v27 = vld [vmem:[%s6354_s27 + $0x2a0] ss:$16 sps:$4 sm:$0xff]   ;;  %v5317_v28 = vld [vmem:[%s6354_s27 + $0x2a8] ss:$16 sps:$4 sm:$0xff]  }
  0x98   : > { %3448 = vmatpush1.bf16.msra.mxu0 %v5234_v31  ;;  %3792 = vmatpush1.bf16.msra.mxu1 %v5235_v32  ;;  %v5322_v29 = vld [vmem:[%s6354_s27 + $0x2c4] ss:$16 sps:$4 sm:$0xff]   ;;  %v5325_v30 = vld [vmem:[%s6354_s27 + $0x2cc] ss:$16 sps:$4 sm:$0xff]   ;;  %v5341_v47 = vld [vmem:[%s6354_s27 + $0x328] ss:$16 sps:$4 sm:$0xff]  }
  0x99   : > { %3449 = vmatprep.subr.bf16.mxu0 %v5236_v33  ;;  %3793 = vmatprep.subr.bf16.mxu1 %v5238_v34  ;;  %v6453_v31 = vld [vmem:[#allocation2 + $0x8] sm:$0xff]  ;;  %v5320_v33 = vld [vmem:[%s6354_s27 + $0x2c0] ss:$16 sps:$4 sm:$0xff]   ;;  %v5346_v48 = vld [vmem:[%s6354_s27 + $0x344] ss:$16 sps:$4 sm:$0xff]  }
  0x9a   : > { %v6455_v32 = vld [vmem:[#allocation2 + $0x48] sm:$0xff] }
  0x9b   : > { %v5323_v34 = vld [vmem:[%s6354_s27 + $0x2c8] ss:$16 sps:$4 sm:$0xff]  }
  0x9c   : > { %3450 = vmatpush1.bf16.msra.mxu0 %v5240_v35  ;;  %3794 = vmatpush1.bf16.msra.mxu1 %v5241_v36  ;;  %v4426_v35 = vcombine.high %v6453_v31, %v6455_v32  ;;  %v5328_v36 = vld [vmem:[%s6354_s27 + $0x2e4] ss:$16 sps:$4 sm:$0xff]   ;;  %v5347_v51 = vld [vmem:[%s6354_s27 + $0x348] ss:$16 sps:$4 sm:$0xff]  }
  0x9d   : > { %3451 = vmatprep.subr.bf16.mxu0 %v5242_v37  ;;  %3795 = vmatprep.subr.bf16.mxu1 %v5244_v38  ;;  %v5331_v37 = vld [vmem:[%s6354_s27 + $0x2ec] ss:$16 sps:$4 sm:$0xff]   ;;  %v5326_v38 = vld [vmem:[%s6354_s27 + $0x2e0] ss:$16 sps:$4 sm:$0xff]  }
  0xa0   : > { %3452 = vmatpush1.bf16.msra.mxu0 %v5246_v39  ;;  %3796 = vmatpush1.bf16.msra.mxu1 %v5247_v40  ;;  %v5329_v39 = vld [vmem:[%s6354_s27 + $0x2e8] ss:$16 sps:$4 sm:$0xff]   ;;  %v5334_v40 = vld [vmem:[%s6354_s27 + $0x304] ss:$16 sps:$4 sm:$0xff]  }
  0xa1   : > { %3453 = vmatprep.subr.bf16.mxu0 %v5248_v41  ;;  %3797 = vmatprep.subr.bf16.mxu1 %v5250_v42  ;;  %v5337_v41 = vld [vmem:[%s6354_s27 + $0x30c] ss:$16 sps:$4 sm:$0xff]   ;;  %v5332_v42 = vld [vmem:[%s6354_s27 + $0x300] ss:$16 sps:$4 sm:$0xff]  }
  0xa4   : > { %3454 = vmatpush1.bf16.msra.mxu0 %v5252_v43  ;;  %3798 = vmatpush1.bf16.msra.mxu1 %v5253_v44  ;;  %v5335_v43 = vld [vmem:[%s6354_s27 + $0x308] ss:$16 sps:$4 sm:$0xff]   ;;  %v5340_v44 = vld [vmem:[%s6354_s27 + $0x324] ss:$16 sps:$4 sm:$0xff]  }
  0xa5   : > { %3455 = vmatprep.subr.bf16.mxu0 %v5254_v45  ;;  %3799 = vmatprep.subr.bf16.mxu1 %v5256_v46  ;;  %v5343_v45 = vld [vmem:[%s6354_s27 + $0x32c] ss:$16 sps:$4 sm:$0xff]   ;;  %v5338_v46 = vld [vmem:[%s6354_s27 + $0x320] ss:$16 sps:$4 sm:$0xff]  }
  0xa8   : > { %3456 = vmatpush1.bf16.msra.mxu0 %v5258_v49  ;;  %3800 = vmatpush1.bf16.msra.mxu1 %v5259_v50  ;;  %v5349_v49 = vld [vmem:[%s6354_s27 + $0x34c] ss:$16 sps:$4 sm:$0xff]   ;;  %v5344_v50 = vld [vmem:[%s6354_s27 + $0x340] ss:$16 sps:$4 sm:$0xff]  }
  0xa9   : > { %3457 = vmatprep.subr.bf16.mxu0 %v5260_v52  ;;  %3801 = vmatprep.subr.bf16.mxu1 %v5262_v53  ;;  %v5352_v52 = vld [vmem:[%s6354_s27 + $0x364] ss:$16 sps:$4 sm:$0xff]   ;;  %v5355_v53 = vld [vmem:[%s6354_s27 + $0x36c] ss:$16 sps:$4 sm:$0xff]  }
  0xac   : > { %3458 = vmatpush1.bf16.msra.mxu0 %v5264_v54  ;;  %3802 = vmatpush1.bf16.msra.mxu1 %v5265_v55  ;;  %v5350_v54 = vld [vmem:[%s6354_s27 + $0x360] ss:$16 sps:$4 sm:$0xff]   ;;  %v5353_v55 = vld [vmem:[%s6354_s27 + $0x368] ss:$16 sps:$4 sm:$0xff]  }
  0xad   : > { %3459 = vmatprep.subr.bf16.mxu0 %v5266_v56  ;;  %3803 = vmatprep.subr.bf16.mxu1 %v5268_v57  ;;  %v5358_v56 = vld [vmem:[%s6354_s27 + $0x384] ss:$16 sps:$4 sm:$0xff]   ;;  %v5361_v57 = vld [vmem:[%s6354_s27 + $0x38c] ss:$16 sps:$4 sm:$0xff]  }
  0xb0   : > { %3460 = vmatpush1.bf16.msra.mxu0 %v5270_v58  ;;  %3804 = vmatpush1.bf16.msra.mxu1 %v5271_v59  ;;  %v5356_v58 = vld [vmem:[%s6354_s27 + $0x380] ss:$16 sps:$4 sm:$0xff]   ;;  %v5359_v59 = vld [vmem:[%s6354_s27 + $0x388] ss:$16 sps:$4 sm:$0xff]  }
  0xb1   : > { %3461 = vmatprep.subr.bf16.mxu0 %v5272_v60  ;;  %3805 = vmatprep.subr.bf16.mxu1 %v5274_v61  ;;  %v5364_v60 = vld [vmem:[%s6354_s27 + $0x3a4] ss:$16 sps:$4 sm:$0xff]   ;;  %v5367_v61 = vld [vmem:[%s6354_s27 + $0x3ac] ss:$16 sps:$4 sm:$0xff]  }
  0xb4   : > { %3462 = vmatpush1.bf16.msra.mxu0 %v5276_v62  ;;  %3806 = vmatpush1.bf16.msra.mxu1 %v5277_v63  ;;  %v5362_v62 = vld [vmem:[%s6354_s27 + $0x3a0] ss:$16 sps:$4 sm:$0xff]   ;;  %v5365_v63 = vld [vmem:[%s6354_s27 + $0x3a8] ss:$16 sps:$4 sm:$0xff]  }
  0xb5   : > { %3463 = vmatprep.subr.bf16.mxu0 %v5278_v0  ;;  %3807 = vmatprep.subr.bf16.mxu1 %v5280_v1  ;;  %v5370_v0 = vld [vmem:[%s6354_s27 + $0x3c4] ss:$16 sps:$4 sm:$0xff]   ;;  %v5373_v1 = vld [vmem:[%s6354_s27 + $0x3cc] ss:$16 sps:$4 sm:$0xff]  }
  0xb8   : > { %3464 = vmatpush1.bf16.msra.mxu0 %v5282_v2  ;;  %3808 = vmatpush1.bf16.msra.mxu1 %v5283_v3  ;;  %v5368_v2 = vld [vmem:[%s6354_s27 + $0x3c0] ss:$16 sps:$4 sm:$0xff]   ;;  %v5371_v3 = vld [vmem:[%s6354_s27 + $0x3c8] ss:$16 sps:$4 sm:$0xff]  }
  0xb9   : > { %3476 = vmatprep.subr.bf16.mxu0 %v5286_v4  ;;  %3820 = vmatprep.subr.bf16.mxu1 %v5289_v5  ;;  %v5376_v4 = vld [vmem:[%s6354_s27 + $0x3e4] ss:$16 sps:$4 sm:$0xff]   ;;  %v5379_v5 = vld [vmem:[%s6354_s27 + $0x3ec] ss:$16 sps:$4 sm:$0xff]  }
  0xbb   : > { %3466 = vmatmul.mubr.bf16.vlgmr.msra.gmra.mrb[0].mxu0 %v4423_v6  ;;  %3810 = vmatmul.mubr.bf16.vlgmr.msra.gmra.mrb[0].mxu1 %v4423_v6  ;;  %v5374_v6 = vld [vmem:[%s6354_s27 + $0x3e0] ss:$16 sps:$4 sm:$0xff]  }
  0xbc   : > { %3477 = vmatpush1.bf16.msra.mxu0 %v5284_v7  ;;  %3821 = vmatpush1.bf16.msra.mxu1 %v5287_v8  ;;  %v5377_v7 = vld [vmem:[%s6354_s27 + $0x3e8] ss:$16 sps:$4 sm:$0xff]   ;;  %v5382_v8 = vld [vmem:[%s6354_s27 + $0x404] ss:$16 sps:$4 sm:$0xff]  }
  0xbd   : > { %3478 = vmatprep.subr.bf16.mxu0 %v5292_v9  ;;  %3822 = vmatprep.subr.bf16.mxu1 %v5295_v10  ;;  %v5385_v9 = vld [vmem:[%s6354_s27 + $0x40c] ss:$16 sps:$4 sm:$0xff]   ;;  %v4425_v10 = vcombine.low %v6453_v31, %v6455_v32  ;;  %v5407_v31 = vld [vmem:[%s6354_s27 + $0x488] ss:$16 sps:$4 sm:$0xff]   ;;  %v5412_v32 = vld [vmem:[%s6354_s27 + $0x4a4] ss:$16 sps:$4 sm:$0xff]  }
  0xbe   : > { %3508 = vmatprep.mubr.bf16.mxu0 %v4426_v35  ;;  %3852 = vmatprep.mubr.bf16.mxu1 %v4426_v35  ;;  %v5413_v35 = vld [vmem:[%s6354_s27 + $0x4a8] ss:$16 sps:$4 sm:$0xff]  }
  0xc0   : > { %3479 = vmatpush1.bf16.msra.mxu0 %v5290_v11  ;;  %3823 = vmatpush1.bf16.msra.mxu1 %v5293_v12  ;;  %v5380_v11 = vld [vmem:[%s6354_s27 + $0x400] ss:$16 sps:$4 sm:$0xff]   ;;  %v5383_v12 = vld [vmem:[%s6354_s27 + $0x408] ss:$16 sps:$4 sm:$0xff]  }
  0xc1   : > { %3480 = vmatprep.subr.bf16.mxu0 %v5298_v13  ;;  %3824 = vmatprep.subr.bf16.mxu1 %v5301_v14  ;;  %v5388_v13 = vld [vmem:[%s6354_s27 + $0x424] ss:$16 sps:$4 sm:$0xff]   ;;  %v5391_v14 = vld [vmem:[%s6354_s27 + $0x42c] ss:$16 sps:$4 sm:$0xff]  }
  0xc4   : > { %3481 = vmatpush1.bf16.msra.mxu0 %v5296_v15  ;;  %3825 = vmatpush1.bf16.msra.mxu1 %v5299_v16  ;;  %v6505_v15 = vld [vmem:[#allocation2 + $0x10] sm:$0xff] }
  0xc5   : > { %3482 = vmatprep.subr.bf16.mxu0 %v5304_v17  ;;  %3826 = vmatprep.subr.bf16.mxu1 %v5307_v18  ;;  %v6507_v16 = vld [vmem:[#allocation2 + $0x50] sm:$0xff] }
  0xc6   : > { %v4428_v17 = vcombine.high %v6505_v15, %v6507_v16  ;;  %v5386_v18 = vld [vmem:[%s6354_s27 + $0x420] ss:$16 sps:$4 sm:$0xff]  }
  0xc8   : > { %3483 = vmatpush1.bf16.msra.mxu0 %v5302_v19  ;;  %3827 = vmatpush1.bf16.msra.mxu1 %v5305_v20  ;;  %v5389_v19 = vld [vmem:[%s6354_s27 + $0x428] ss:$16 sps:$4 sm:$0xff]   ;;  %v5394_v20 = vld [vmem:[%s6354_s27 + $0x444] ss:$16 sps:$4 sm:$0xff]  }
  0xc9   : > { %3484 = vmatprep.subr.bf16.mxu0 %v5310_v21  ;;  %3828 = vmatprep.subr.bf16.mxu1 %v5313_v22  ;;  %v5397_v21 = vld [vmem:[%s6354_s27 + $0x44c] ss:$16 sps:$4 sm:$0xff]   ;;  %v5392_v22 = vld [vmem:[%s6354_s27 + $0x440] ss:$16 sps:$4 sm:$0xff]  }
  0xcc   : > { %3485 = vmatpush1.bf16.msra.mxu0 %v5308_v23  ;;  %3829 = vmatpush1.bf16.msra.mxu1 %v5311_v24  ;;  %v5395_v23 = vld [vmem:[%s6354_s27 + $0x448] ss:$16 sps:$4 sm:$0xff]   ;;  %v5400_v24 = vld [vmem:[%s6354_s27 + $0x464] ss:$16 sps:$4 sm:$0xff]  }
  0xcd   : > { %3486 = vmatprep.subr.bf16.mxu0 %v5316_v25  ;;  %3830 = vmatprep.subr.bf16.mxu1 %v5319_v26  ;;  %v5403_v25 = vld [vmem:[%s6354_s27 + $0x46c] ss:$16 sps:$4 sm:$0xff]   ;;  %v5398_v26 = vld [vmem:[%s6354_s27 + $0x460] ss:$16 sps:$4 sm:$0xff]  }
  0xd0   : > { %3487 = vmatpush1.bf16.msra.mxu0 %v5314_v27  ;;  %3831 = vmatpush1.bf16.msra.mxu1 %v5317_v28  ;;  %v5401_v27 = vld [vmem:[%s6354_s27 + $0x468] ss:$16 sps:$4 sm:$0xff]   ;;  %v5406_v28 = vld [vmem:[%s6354_s27 + $0x484] ss:$16 sps:$4 sm:$0xff]  }
  0xd1   : > { %3488 = vmatprep.subr.bf16.mxu0 %v5322_v29  ;;  %3832 = vmatprep.subr.bf16.mxu1 %v5325_v30  ;;  %v5409_v29 = vld [vmem:[%s6354_s27 + $0x48c] ss:$16 sps:$4 sm:$0xff]   ;;  %v5404_v30 = vld [vmem:[%s6354_s27 + $0x480] ss:$16 sps:$4 sm:$0xff]  }
  0xd4   : > { %3489 = vmatpush1.bf16.msra.mxu0 %v5320_v33  ;;  %3833 = vmatpush1.bf16.msra.mxu1 %v5323_v34  ;;  %v5415_v33 = vld [vmem:[%s6354_s27 + $0x4ac] ss:$16 sps:$4 sm:$0xff]   ;;  %v5410_v34 = vld [vmem:[%s6354_s27 + $0x4a0] ss:$16 sps:$4 sm:$0xff]  }
  0xd5   : > { %3490 = vmatprep.subr.bf16.mxu0 %v5328_v36  ;;  %3834 = vmatprep.subr.bf16.mxu1 %v5331_v37  ;;  %v5418_v36 = vld [vmem:[%s6354_s27 + $0x4c4] ss:$16 sps:$4 sm:$0xff]   ;;  %v5421_v37 = vld [vmem:[%s6354_s27 + $0x4cc] ss:$16 sps:$4 sm:$0xff]  }
  0xd8   : > { %3491 = vmatpush1.bf16.msra.mxu0 %v5326_v38  ;;  %3835 = vmatpush1.bf16.msra.mxu1 %v5329_v39  ;;  %v5416_v38 = vld [vmem:[%s6354_s27 + $0x4c0] ss:$16 sps:$4 sm:$0xff]   ;;  %v5419_v39 = vld [vmem:[%s6354_s27 + $0x4c8] ss:$16 sps:$4 sm:$0xff]  }
  0xd9   : > { %3492 = vmatprep.subr.bf16.mxu0 %v5334_v40  ;;  %3836 = vmatprep.subr.bf16.mxu1 %v5337_v41  ;;  %v5424_v40 = vld [vmem:[%s6354_s27 + $0x4e4] ss:$16 sps:$4 sm:$0xff]   ;;  %v5427_v41 = vld [vmem:[%s6354_s27 + $0x4ec] ss:$16 sps:$4 sm:$0xff]  }
  0xdc   : > { %3493 = vmatpush1.bf16.msra.mxu0 %v5332_v42  ;;  %3837 = vmatpush1.bf16.msra.mxu1 %v5335_v43  ;;  %v5422_v42 = vld [vmem:[%s6354_s27 + $0x4e0] ss:$16 sps:$4 sm:$0xff]   ;;  %v5425_v43 = vld [vmem:[%s6354_s27 + $0x4e8] ss:$16 sps:$4 sm:$0xff]  }
  0xdd   : > { %3494 = vmatprep.subr.bf16.mxu0 %v5340_v44  ;;  %3838 = vmatprep.subr.bf16.mxu1 %v5343_v45  ;;  %v5430_v44 = vld [vmem:[%s6354_s27 + $0x504] ss:$16 sps:$4 sm:$0xff]   ;;  %v5433_v45 = vld [vmem:[%s6354_s27 + $0x50c] ss:$16 sps:$4 sm:$0xff]  }
  0xe0   : > { %3495 = vmatpush1.bf16.msra.mxu0 %v5338_v46  ;;  %3839 = vmatpush1.bf16.msra.mxu1 %v5341_v47  ;;  %v5428_v46 = vld [vmem:[%s6354_s27 + $0x500] ss:$16 sps:$4 sm:$0xff]   ;;  %v5431_v47 = vld [vmem:[%s6354_s27 + $0x508] ss:$16 sps:$4 sm:$0xff]  }
  0xe1   : > { %3496 = vmatprep.subr.bf16.mxu0 %v5346_v48  ;;  %3840 = vmatprep.subr.bf16.mxu1 %v5349_v49  ;;  %v5436_v48 = vld [vmem:[%s6354_s27 + $0x524] ss:$16 sps:$4 sm:$0xff]   ;;  %v5439_v49 = vld [vmem:[%s6354_s27 + $0x52c] ss:$16 sps:$4 sm:$0xff]  }
  0xe4   : > { %3497 = vmatpush1.bf16.msra.mxu0 %v5344_v50  ;;  %3841 = vmatpush1.bf16.msra.mxu1 %v5347_v51  ;;  %v5434_v50 = vld [vmem:[%s6354_s27 + $0x520] ss:$16 sps:$4 sm:$0xff]   ;;  %v5437_v51 = vld [vmem:[%s6354_s27 + $0x528] ss:$16 sps:$4 sm:$0xff]  }
  0xe5   : > { %3498 = vmatprep.subr.bf16.mxu0 %v5352_v52  ;;  %3842 = vmatprep.subr.bf16.mxu1 %v5355_v53  ;;  %v5442_v52 = vld [vmem:[%s6354_s27 + $0x544] ss:$16 sps:$4 sm:$0xff]   ;;  %v5445_v53 = vld [vmem:[%s6354_s27 + $0x54c] ss:$16 sps:$4 sm:$0xff]  }
  0xe8   : > { %3499 = vmatpush1.bf16.msra.mxu0 %v5350_v54  ;;  %3843 = vmatpush1.bf16.msra.mxu1 %v5353_v55  ;;  %v5440_v54 = vld [vmem:[%s6354_s27 + $0x540] ss:$16 sps:$4 sm:$0xff]   ;;  %v5443_v55 = vld [vmem:[%s6354_s27 + $0x548] ss:$16 sps:$4 sm:$0xff]  }
  0xe9   : > { %3500 = vmatprep.subr.bf16.mxu0 %v5358_v56  ;;  %3844 = vmatprep.subr.bf16.mxu1 %v5361_v57  ;;  %v5448_v56 = vld [vmem:[%s6354_s27 + $0x564] ss:$16 sps:$4 sm:$0xff]   ;;  %v5451_v57 = vld [vmem:[%s6354_s27 + $0x56c] ss:$16 sps:$4 sm:$0xff]  }
  0xec   : > { %3501 = vmatpush1.bf16.msra.mxu0 %v5356_v58  ;;  %3845 = vmatpush1.bf16.msra.mxu1 %v5359_v59  ;;  %v5446_v58 = vld [vmem:[%s6354_s27 + $0x560] ss:$16 sps:$4 sm:$0xff]   ;;  %v5449_v59 = vld [vmem:[%s6354_s27 + $0x568] ss:$16 sps:$4 sm:$0xff]  }
  0xed   : > { %3502 = vmatprep.subr.bf16.mxu0 %v5364_v60  ;;  %3846 = vmatprep.subr.bf16.mxu1 %v5367_v61  ;;  %v5454_v60 = vld [vmem:[%s6354_s27 + $0x584] ss:$16 sps:$4 sm:$0xff]   ;;  %v5457_v61 = vld [vmem:[%s6354_s27 + $0x58c] ss:$16 sps:$4 sm:$0xff]  }
  0xf0   : > { %3503 = vmatpush1.bf16.msra.mxu0 %v5362_v62  ;;  %3847 = vmatpush1.bf16.msra.mxu1 %v5365_v63  ;;  %v5452_v62 = vld [vmem:[%s6354_s27 + $0x580] ss:$16 sps:$4 sm:$0xff]   ;;  %v5455_v63 = vld [vmem:[%s6354_s27 + $0x588] ss:$16 sps:$4 sm:$0xff]  }
  0xf1   : > { %3504 = vmatprep.subr.bf16.mxu0 %v5370_v0  ;;  %3848 = vmatprep.subr.bf16.mxu1 %v5373_v1  ;;  %v5460_v0 = vld [vmem:[%s6354_s27 + $0x5a4] ss:$16 sps:$4 sm:$0xff]   ;;  %v5463_v1 = vld [vmem:[%s6354_s27 + $0x5ac] ss:$16 sps:$4 sm:$0xff]  }
  0xf4   : > { %3505 = vmatpush1.bf16.msra.mxu0 %v5368_v2  ;;  %3849 = vmatpush1.bf16.msra.mxu1 %v5371_v3  ;;  %v5458_v2 = vld [vmem:[%s6354_s27 + $0x5a0] ss:$16 sps:$4 sm:$0xff]   ;;  %v5461_v3 = vld [vmem:[%s6354_s27 + $0x5a8] ss:$16 sps:$4 sm:$0xff]  }
  0xf5   : > { %3506 = vmatprep.subr.bf16.mxu0 %v5376_v4  ;;  %3850 = vmatprep.subr.bf16.mxu1 %v5379_v5  ;;  %v5466_v4 = vld [vmem:[%s6354_s27 + $0x5c4] ss:$16 sps:$4 sm:$0xff]   ;;  %v5469_v5 = vld [vmem:[%s6354_s27 + $0x5cc] ss:$16 sps:$4 sm:$0xff]  }
  0xf8   : > { %3507 = vmatpush1.bf16.msra.mxu0 %v5374_v6  ;;  %3851 = vmatpush1.bf16.msra.mxu1 %v5377_v7  ;;  %v5464_v6 = vld [vmem:[%s6354_s27 + $0x5c0] ss:$16 sps:$4 sm:$0xff]   ;;  %v5467_v7 = vld [vmem:[%s6354_s27 + $0x5c8] ss:$16 sps:$4 sm:$0xff]  }
  0xf9   : > { %3519 = vmatprep.subr.bf16.mxu0 %v5382_v8  ;;  %3863 = vmatprep.subr.bf16.mxu1 %v5385_v9  ;;  %v5472_v8 = vld [vmem:[%s6354_s27 + $0x5e4] ss:$16 sps:$4 sm:$0xff]   ;;  %v5475_v9 = vld [vmem:[%s6354_s27 + $0x5ec] ss:$16 sps:$4 sm:$0xff]  }
  0xfb   : > { %3509 = vmatmul.mubr.bf16.vlgmr.msra.gmra.mrb[0].mxu0 %v4425_v10  ;;  %3853 = vmatmul.mubr.bf16.vlgmr.msra.gmra.mrb[0].mxu1 %v4425_v10  ;;  %v5470_v10 = vld [vmem:[%s6354_s27 + $0x5e0] ss:$16 sps:$4 sm:$0xff]  }
  0xfc   : > { %3520 = vmatpush1.bf16.msra.mxu0 %v5380_v11  ;;  %3864 = vmatpush1.bf16.msra.mxu1 %v5383_v12  ;;  %v5473_v11 = vld [vmem:[%s6354_s27 + $0x5e8] ss:$16 sps:$4 sm:$0xff]   ;;  %v5478_v12 = vld [vmem:[%s6354_s27 + $0x604] ss:$16 sps:$4 sm:$0xff]  }
  0xfd   : > { %3521 = vmatprep.subr.bf16.mxu0 %v5388_v13  ;;  %3865 = vmatprep.subr.bf16.mxu1 %v5391_v14  ;;  %v5481_v13 = vld [vmem:[%s6354_s27 + $0x60c] ss:$16 sps:$4 sm:$0xff]   ;;  %v5476_v14 = vld [vmem:[%s6354_s27 + $0x600] ss:$16 sps:$4 sm:$0xff]  }
  0xfe   : > { %3551 = vmatprep.mubr.bf16.mxu0 %v4428_v17  ;;  %3895 = vmatprep.mubr.bf16.mxu1 %v4428_v17  ;;  %v5479_v17 = vld [vmem:[%s6354_s27 + $0x608] ss:$16 sps:$4 sm:$0xff]  }
 0x100   : > { %3522 = vmatpush1.bf16.msra.mxu0 %v5386_v18  ;;  %3866 = vmatpush1.bf16.msra.mxu1 %v5389_v19  ;;  %v4427_v18 = vcombine.low %v6505_v15, %v6507_v16  ;;  %v6575_v19 = vld [vmem:[#allocation2 + $0x18] sm:$0xff]  ;;  %v5482_v15 = vld [vmem:[%s6354_s27 + $0x620] ss:$16 sps:$4 sm:$0xff]  }
 0x101   : > { %3523 = vmatprep.subr.bf16.mxu0 %v5394_v20  ;;  %3867 = vmatprep.subr.bf16.mxu1 %v5397_v21  ;;  %v6577_v20 = vld [vmem:[#allocation2 + $0x58] sm:$0xff]  ;;  %v5484_v21 = vld [vmem:[%s6354_s27 + $0x624] ss:$16 sps:$4 sm:$0xff]  }
 0x102   : > { %v5485_v16 = vld [vmem:[%s6354_s27 + $0x628] ss:$16 sps:$4 sm:$0xff]  }
 0x104   : > { %3524 = vmatpush1.bf16.msra.mxu0 %v5392_v22  ;;  %3868 = vmatpush1.bf16.msra.mxu1 %v5395_v23  ;;  %v5487_v22 = vld [vmem:[%s6354_s27 + $0x62c] ss:$16 sps:$4 sm:$0xff]   ;;  %v4430_v23 = vcombine.high %v6575_v19, %v6577_v20 }
 0x105   : > { %3525 = vmatprep.subr.bf16.mxu0 %v5400_v24  ;;  %3869 = vmatprep.subr.bf16.mxu1 %v5403_v25  ;;  %v5490_v24 = vld [vmem:[%s6354_s27 + $0x644] ss:$16 sps:$4 sm:$0xff]   ;;  %v5493_v25 = vld [vmem:[%s6354_s27 + $0x64c] ss:$16 sps:$4 sm:$0xff]  }
 0x108   : > { %3526 = vmatpush1.bf16.msra.mxu0 %v5398_v26  ;;  %3870 = vmatpush1.bf16.msra.mxu1 %v5401_v27  ;;  %v5488_v26 = vld [vmem:[%s6354_s27 + $0x640] ss:$16 sps:$4 sm:$0xff]   ;;  %v5491_v27 = vld [vmem:[%s6354_s27 + $0x648] ss:$16 sps:$4 sm:$0xff]  }
 0x109   : > { %3527 = vmatprep.subr.bf16.mxu0 %v5406_v28  ;;  %3871 = vmatprep.subr.bf16.mxu1 %v5409_v29  ;;  %v5496_v28 = vld [vmem:[%s6354_s27 + $0x664] ss:$16 sps:$4 sm:$0xff]   ;;  %v5499_v29 = vld [vmem:[%s6354_s27 + $0x66c] ss:$16 sps:$4 sm:$0xff]  }
 0x10c   : > { %3528 = vmatpush1.bf16.msra.mxu0 %v5404_v30  ;;  %3872 = vmatpush1.bf16.msra.mxu1 %v5407_v31  ;;  %v5494_v30 = vld [vmem:[%s6354_s27 + $0x660] ss:$16 sps:$4 sm:$0xff]   ;;  %v5497_v31 = vld [vmem:[%s6354_s27 + $0x668] ss:$16 sps:$4 sm:$0xff]  }
 0x10d   : > { %3529 = vmatprep.subr.bf16.mxu0 %v5412_v32  ;;  %3873 = vmatprep.subr.bf16.mxu1 %v5415_v33  ;;  %v5502_v32 = vld [vmem:[%s6354_s27 + $0x684] ss:$16 sps:$4 sm:$0xff]   ;;  %v5505_v33 = vld [vmem:[%s6354_s27 + $0x68c] ss:$16 sps:$4 sm:$0xff]  }
 0x110   : > { %3530 = vmatpush1.bf16.msra.mxu0 %v5410_v34  ;;  %3874 = vmatpush1.bf16.msra.mxu1 %v5413_v35  ;;  %v5500_v34 = vld [vmem:[%s6354_s27 + $0x680] ss:$16 sps:$4 sm:$0xff]   ;;  %v5503_v35 = vld [vmem:[%s6354_s27 + $0x688] ss:$16 sps:$4 sm:$0xff]  }
 0x111   : > { %3531 = vmatprep.subr.bf16.mxu0 %v5418_v36  ;;  %3875 = vmatprep.subr.bf16.mxu1 %v5421_v37  ;;  %v5508_v36 = vld [vmem:[%s6354_s27 + $0x6a4] ss:$16 sps:$4 sm:$0xff]   ;;  %v5511_v37 = vld [vmem:[%s6354_s27 + $0x6ac] ss:$16 sps:$4 sm:$0xff]  }
 0x114   : > { %3532 = vmatpush1.bf16.msra.mxu0 %v5416_v38  ;;  %3876 = vmatpush1.bf16.msra.mxu1 %v5419_v39  ;;  %v5506_v38 = vld [vmem:[%s6354_s27 + $0x6a0] ss:$16 sps:$4 sm:$0xff]   ;;  %v5509_v39 = vld [vmem:[%s6354_s27 + $0x6a8] ss:$16 sps:$4 sm:$0xff]  }
 0x115   : > { %3533 = vmatprep.subr.bf16.mxu0 %v5424_v40  ;;  %3877 = vmatprep.subr.bf16.mxu1 %v5427_v41  ;;  %v5514_v40 = vld [vmem:[%s6354_s27 + $0x6c4] ss:$16 sps:$4 sm:$0xff]   ;;  %v5517_v41 = vld [vmem:[%s6354_s27 + $0x6cc] ss:$16 sps:$4 sm:$0xff]  }
 0x118   : > { %3534 = vmatpush1.bf16.msra.mxu0 %v5422_v42  ;;  %3878 = vmatpush1.bf16.msra.mxu1 %v5425_v43  ;;  %v5512_v42 = vld [vmem:[%s6354_s27 + $0x6c0] ss:$16 sps:$4 sm:$0xff]   ;;  %v5515_v43 = vld [vmem:[%s6354_s27 + $0x6c8] ss:$16 sps:$4 sm:$0xff]  }
 0x119   : > { %3535 = vmatprep.subr.bf16.mxu0 %v5430_v44  ;;  %3879 = vmatprep.subr.bf16.mxu1 %v5433_v45  ;;  %v5520_v44 = vld [vmem:[%s6354_s27 + $0x6e4] ss:$16 sps:$4 sm:$0xff]   ;;  %v5523_v45 = vld [vmem:[%s6354_s27 + $0x6ec] ss:$16 sps:$4 sm:$0xff]  }
 0x11c   : > { %3536 = vmatpush1.bf16.msra.mxu0 %v5428_v46  ;;  %3880 = vmatpush1.bf16.msra.mxu1 %v5431_v47  ;;  %v5518_v46 = vld [vmem:[%s6354_s27 + $0x6e0] ss:$16 sps:$4 sm:$0xff]   ;;  %v5521_v47 = vld [vmem:[%s6354_s27 + $0x6e8] ss:$16 sps:$4 sm:$0xff]  }
 0x11d   : > { %3537 = vmatprep.subr.bf16.mxu0 %v5436_v48  ;;  %3881 = vmatprep.subr.bf16.mxu1 %v5439_v49  ;;  %v5526_v48 = vld [vmem:[%s6354_s27 + $0x704] ss:$16 sps:$4 sm:$0xff]   ;;  %v5529_v49 = vld [vmem:[%s6354_s27 + $0x70c] ss:$16 sps:$4 sm:$0xff]  }
 0x120   : > { %3538 = vmatpush1.bf16.msra.mxu0 %v5434_v50  ;;  %3882 = vmatpush1.bf16.msra.mxu1 %v5437_v51  ;;  %v5524_v50 = vld [vmem:[%s6354_s27 + $0x700] ss:$16 sps:$4 sm:$0xff]   ;;  %v5527_v51 = vld [vmem:[%s6354_s27 + $0x708] ss:$16 sps:$4 sm:$0xff]  }
 0x121   : > { %3539 = vmatprep.subr.bf16.mxu0 %v5442_v52  ;;  %3883 = vmatprep.subr.bf16.mxu1 %v5445_v53  ;;  %v5532_v52 = vld [vmem:[%s6354_s27 + $0x724] ss:$16 sps:$4 sm:$0xff]   ;;  %v5535_v53 = vld [vmem:[%s6354_s27 + $0x72c] ss:$16 sps:$4 sm:$0xff]  }
 0x124   : > { %3540 = vmatpush1.bf16.msra.mxu0 %v5440_v54  ;;  %3884 = vmatpush1.bf16.msra.mxu1 %v5443_v55  ;;  %v5530_v54 = vld [vmem:[%s6354_s27 + $0x720] ss:$16 sps:$4 sm:$0xff]   ;;  %v5533_v55 = vld [vmem:[%s6354_s27 + $0x728] ss:$16 sps:$4 sm:$0xff]  }
 0x125   : > { %3541 = vmatprep.subr.bf16.mxu0 %v5448_v56  ;;  %3885 = vmatprep.subr.bf16.mxu1 %v5451_v57  ;;  %v5538_v56 = vld [vmem:[%s6354_s27 + $0x744] ss:$16 sps:$4 sm:$0xff]   ;;  %v5541_v57 = vld [vmem:[%s6354_s27 + $0x74c] ss:$16 sps:$4 sm:$0xff]  }
 0x128   : > { %3542 = vmatpush1.bf16.msra.mxu0 %v5446_v58  ;;  %3886 = vmatpush1.bf16.msra.mxu1 %v5449_v59  ;;  %v5536_v58 = vld [vmem:[%s6354_s27 + $0x740] ss:$16 sps:$4 sm:$0xff]   ;;  %v5539_v59 = vld [vmem:[%s6354_s27 + $0x748] ss:$16 sps:$4 sm:$0xff]  }
 0x129   : > { %3543 = vmatprep.subr.bf16.mxu0 %v5454_v60  ;;  %3887 = vmatprep.subr.bf16.mxu1 %v5457_v61  ;;  %v5544_v60 = vld [vmem:[%s6354_s27 + $0x764] ss:$16 sps:$4 sm:$0xff]   ;;  %v5547_v61 = vld [vmem:[%s6354_s27 + $0x76c] ss:$16 sps:$4 sm:$0xff]  }
 0x12c   : > { %3544 = vmatpush1.bf16.msra.mxu0 %v5452_v62  ;;  %3888 = vmatpush1.bf16.msra.mxu1 %v5455_v63  ;;  %v5542_v62 = vld [vmem:[%s6354_s27 + $0x760] ss:$16 sps:$4 sm:$0xff]   ;;  %v5545_v63 = vld [vmem:[%s6354_s27 + $0x768] ss:$16 sps:$4 sm:$0xff]  }
 0x12d   : > { %3545 = vmatprep.subr.bf16.mxu0 %v5460_v0  ;;  %3889 = vmatprep.subr.bf16.mxu1 %v5463_v1  ;;  %v5550_v0 = vld [vmem:[%s6354_s27 + $0x784] ss:$16 sps:$4 sm:$0xff]   ;;  %v5553_v1 = vld [vmem:[%s6354_s27 + $0x78c] ss:$16 sps:$4 sm:$0xff]  }
 0x130   : > { %3546 = vmatpush1.bf16.msra.mxu0 %v5458_v2  ;;  %3890 = vmatpush1.bf16.msra.mxu1 %v5461_v3  ;;  %v5548_v2 = vld [vmem:[%s6354_s27 + $0x780] ss:$16 sps:$4 sm:$0xff]   ;;  %v5551_v3 = vld [vmem:[%s6354_s27 + $0x788] ss:$16 sps:$4 sm:$0xff]  }
 0x131   : > { %3547 = vmatprep.subr.bf16.mxu0 %v5466_v4  ;;  %3891 = vmatprep.subr.bf16.mxu1 %v5469_v5  ;;  %v5556_v4 = vld [vmem:[%s6354_s27 + $0x7a4] ss:$16 sps:$4 sm:$0xff]   ;;  %v5559_v5 = vld [vmem:[%s6354_s27 + $0x7ac] ss:$16 sps:$4 sm:$0xff]  }
 0x134   : > { %3548 = vmatpush1.bf16.msra.mxu0 %v5464_v6  ;;  %3892 = vmatpush1.bf16.msra.mxu1 %v5467_v7  ;;  %v5554_v6 = vld [vmem:[%s6354_s27 + $0x7a0] ss:$16 sps:$4 sm:$0xff]   ;;  %v5557_v7 = vld [vmem:[%s6354_s27 + $0x7a8] ss:$16 sps:$4 sm:$0xff]  }
 0x135   : > { %3549 = vmatprep.subr.bf16.mxu0 %v5472_v8  ;;  %3893 = vmatprep.subr.bf16.mxu1 %v5475_v9  ;;  %v5562_v8 = vld [vmem:[%s6354_s27 + $0x7c4] ss:$16 sps:$4 sm:$0xff]   ;;  %v5565_v9 = vld [vmem:[%s6354_s27 + $0x7cc] ss:$16 sps:$4 sm:$0xff]  }
 0x138   : > { %3550 = vmatpush1.bf16.msra.mxu0 %v5470_v10  ;;  %3894 = vmatpush1.bf16.msra.mxu1 %v5473_v11  ;;  %v5560_v10 = vld [vmem:[%s6354_s27 + $0x7c0] ss:$16 sps:$4 sm:$0xff]   ;;  %v5563_v11 = vld [vmem:[%s6354_s27 + $0x7c8] ss:$16 sps:$4 sm:$0xff]  }
 0x139   : > { %3562 = vmatprep.subr.bf16.mxu0 %v5478_v12  ;;  %3906 = vmatprep.subr.bf16.mxu1 %v5481_v13  ;;  %v5568_v12 = vld [vmem:[%s6354_s27 + $0x7e4] ss:$16 sps:$4 sm:$0xff]   ;;  %v5571_v13 = vld [vmem:[%s6354_s27 + $0x7ec] ss:$16 sps:$4 sm:$0xff]  }
 0x13b   : > { %3552 = vmatmul.mubr.bf16.vlgmr.msra.gmra.mrb[0].mxu0 %v4427_v18  ;;  %3896 = vmatmul.mubr.bf16.vlgmr.msra.gmra.mrb[0].mxu1 %v4427_v18  ;;  %v5574_v18 = vld [vmem:[%s6354_s27 + $0x804] ss:$16 sps:$4 sm:$0xff]  }
 0x13c   : > { %3563 = vmatpush1.bf16.msra.mxu0 %v5476_v14  ;;  %3907 = vmatpush1.bf16.msra.mxu1 %v5479_v17  ;;  %v5566_v14 = vld [vmem:[%s6354_s27 + $0x7e0] ss:$16 sps:$4 sm:$0xff]   ;;  %v5569_v17 = vld [vmem:[%s6354_s27 + $0x7e8] ss:$16 sps:$4 sm:$0xff]  }
 0x13d   : > { %3564 = vmatprep.subr.bf16.mxu0 %v5484_v21  ;;  %3908 = vmatprep.subr.bf16.mxu1 %v5487_v22  ;;  %v5577_v21 = vld [vmem:[%s6354_s27 + $0x80c] ss:$16 sps:$4 sm:$0xff]   ;;  %v6643_v22 = vld [vmem:[#allocation2 + $0x20] sm:$0xff] }
 0x13e   : > { %3594 = vmatprep.mubr.bf16.mxu0 %v4430_v23  ;;  %3938 = vmatprep.mubr.bf16.mxu1 %v4430_v23  ;;  %v4429_v23 = vcombine.low %v6575_v19, %v6577_v20  ;;  %v5578_v19 = vld [vmem:[%s6354_s27 + $0x820] ss:$16 sps:$4 sm:$0xff]   ;;  %v5581_v20 = vld [vmem:[%s6354_s27 + $0x828] ss:$16 sps:$4 sm:$0xff]  }
 0x140   : > { %3565 = vmatpush1.bf16.msra.mxu0 %v5482_v15  ;;  %3909 = vmatpush1.bf16.msra.mxu1 %v5485_v16  ;;  %v6647_v15 = vld [vmem:[#allocation2 + $0x60] sm:$0xff] }
 0x141   : > { %3566 = vmatprep.subr.bf16.mxu0 %v5490_v24  ;;  %3910 = vmatprep.subr.bf16.mxu1 %v5493_v25  ;;  %v5572_v16 = vld [vmem:[%s6354_s27 + $0x800] ss:$16 sps:$4 sm:$0xff]   ;;  %v5575_v24 = vld [vmem:[%s6354_s27 + $0x808] ss:$16 sps:$4 sm:$0xff]   ;;  %v5580_v25 = vld [vmem:[%s6354_s27 + $0x824] ss:$16 sps:$4 sm:$0xff]  }
 0x144   : > { %3567 = vmatpush1.bf16.msra.mxu0 %v5488_v26  ;;  %3911 = vmatpush1.bf16.msra.mxu1 %v5491_v27  ;;  %v5583_v26 = vld [vmem:[%s6354_s27 + $0x82c] ss:$16 sps:$4 sm:$0xff]   ;;  %v4432_v27 = vcombine.high %v6643_v22, %v6647_v15 }
 0x145   : > { %3568 = vmatprep.subr.bf16.mxu0 %v5496_v28  ;;  %3912 = vmatprep.subr.bf16.mxu1 %v5499_v29  ;;  %v5586_v28 = vld [vmem:[%s6354_s27 + $0x844] ss:$16 sps:$4 sm:$0xff]   ;;  %v5589_v29 = vld [vmem:[%s6354_s27 + $0x84c] ss:$16 sps:$4 sm:$0xff]  }
 0x148   : > { %3569 = vmatpush1.bf16.msra.mxu0 %v5494_v30  ;;  %3913 = vmatpush1.bf16.msra.mxu1 %v5497_v31  ;;  %v5584_v30 = vld [vmem:[%s6354_s27 + $0x840] ss:$16 sps:$4 sm:$0xff]   ;;  %v5587_v31 = vld [vmem:[%s6354_s27 + $0x848] ss:$16 sps:$4 sm:$0xff]  }
 0x149   : > { %3570 = vmatprep.subr.bf16.mxu0 %v5502_v32  ;;  %3914 = vmatprep.subr.bf16.mxu1 %v5505_v33  ;;  %v5592_v32 = vld [vmem:[%s6354_s27 + $0x864] ss:$16 sps:$4 sm:$0xff]   ;;  %v5595_v33 = vld [vmem:[%s6354_s27 + $0x86c] ss:$16 sps:$4 sm:$0xff]  }
 0x14c   : > { %3571 = vmatpush1.bf16.msra.mxu0 %v5500_v34  ;;  %3915 = vmatpush1.bf16.msra.mxu1 %v5503_v35  ;;  %v5590_v34 = vld [vmem:[%s6354_s27 + $0x860] ss:$16 sps:$4 sm:$0xff]   ;;  %v5593_v35 = vld [vmem:[%s6354_s27 + $0x868] ss:$16 sps:$4 sm:$0xff]  }
 0x14d   : > { %3572 = vmatprep.subr.bf16.mxu0 %v5508_v36  ;;  %3916 = vmatprep.subr.bf16.mxu1 %v5511_v37  ;;  %v5598_v36 = vld [vmem:[%s6354_s27 + $0x884] ss:$16 sps:$4 sm:$0xff]   ;;  %v5601_v37 = vld [vmem:[%s6354_s27 + $0x88c] ss:$16 sps:$4 sm:$0xff]  }
 0x150   : > { %3573 = vmatpush1.bf16.msra.mxu0 %v5506_v38  ;;  %3917 = vmatpush1.bf16.msra.mxu1 %v5509_v39  ;;  %v5596_v38 = vld [vmem:[%s6354_s27 + $0x880] ss:$16 sps:$4 sm:$0xff]   ;;  %v5599_v39 = vld [vmem:[%s6354_s27 + $0x888] ss:$16 sps:$4 sm:$0xff]  }
 0x151   : > { %3574 = vmatprep.subr.bf16.mxu0 %v5514_v40  ;;  %3918 = vmatprep.subr.bf16.mxu1 %v5517_v41  ;;  %v5604_v40 = vld [vmem:[%s6354_s27 + $0x8a4] ss:$16 sps:$4 sm:$0xff]   ;;  %v5607_v41 = vld [vmem:[%s6354_s27 + $0x8ac] ss:$16 sps:$4 sm:$0xff]  }
 0x154   : > { %3575 = vmatpush1.bf16.msra.mxu0 %v5512_v42  ;;  %3919 = vmatpush1.bf16.msra.mxu1 %v5515_v43  ;;  %v5602_v42 = vld [vmem:[%s6354_s27 + $0x8a0] ss:$16 sps:$4 sm:$0xff]   ;;  %v5605_v43 = vld [vmem:[%s6354_s27 + $0x8a8] ss:$16 sps:$4 sm:$0xff]  }
 0x155   : > { %3576 = vmatprep.subr.bf16.mxu0 %v5520_v44  ;;  %3920 = vmatprep.subr.bf16.mxu1 %v5523_v45  ;;  %v5610_v44 = vld [vmem:[%s6354_s27 + $0x8c4] ss:$16 sps:$4 sm:$0xff]   ;;  %v5613_v45 = vld [vmem:[%s6354_s27 + $0x8cc] ss:$16 sps:$4 sm:$0xff]  }
 0x158   : > { %3577 = vmatpush1.bf16.msra.mxu0 %v5518_v46  ;;  %3921 = vmatpush1.bf16.msra.mxu1 %v5521_v47  ;;  %v5608_v46 = vld [vmem:[%s6354_s27 + $0x8c0] ss:$16 sps:$4 sm:$0xff]   ;;  %v5611_v47 = vld [vmem:[%s6354_s27 + $0x8c8] ss:$16 sps:$4 sm:$0xff]  }
 0x159   : > { %3578 = vmatprep.subr.bf16.mxu0 %v5526_v48  ;;  %3922 = vmatprep.subr.bf16.mxu1 %v5529_v49  ;;  %v5616_v48 = vld [vmem:[%s6354_s27 + $0x8e4] ss:$16 sps:$4 sm:$0xff]   ;;  %v5619_v49 = vld [vmem:[%s6354_s27 + $0x8ec] ss:$16 sps:$4 sm:$0xff]  }
 0x15c   : > { %3579 = vmatpush1.bf16.msra.mxu0 %v5524_v50  ;;  %3923 = vmatpush1.bf16.msra.mxu1 %v5527_v51  ;;  %v5614_v50 = vld [vmem:[%s6354_s27 + $0x8e0] ss:$16 sps:$4 sm:$0xff]   ;;  %v5617_v51 = vld [vmem:[%s6354_s27 + $0x8e8] ss:$16 sps:$4 sm:$0xff]  }
 0x15d   : > { %3580 = vmatprep.subr.bf16.mxu0 %v5532_v52  ;;  %3924 = vmatprep.subr.bf16.mxu1 %v5535_v53  ;;  %v5622_v52 = vld [vmem:[%s6354_s27 + $0x904] ss:$16 sps:$4 sm:$0xff]   ;;  %v5625_v53 = vld [vmem:[%s6354_s27 + $0x90c] ss:$16 sps:$4 sm:$0xff]  }
 0x160   : > { %3581 = vmatpush1.bf16.msra.mxu0 %v5530_v54  ;;  %3925 = vmatpush1.bf16.msra.mxu1 %v5533_v55  ;;  %v5620_v54 = vld [vmem:[%s6354_s27 + $0x900] ss:$16 sps:$4 sm:$0xff]   ;;  %v5623_v55 = vld [vmem:[%s6354_s27 + $0x908] ss:$16 sps:$4 sm:$0xff]  }
 0x161   : > { %3582 = vmatprep.subr.bf16.mxu0 %v5538_v56  ;;  %3926 = vmatprep.subr.bf16.mxu1 %v5541_v57  ;;  %v5628_v56 = vld [vmem:[%s6354_s27 + $0x924] ss:$16 sps:$4 sm:$0xff]   ;;  %v5631_v57 = vld [vmem:[%s6354_s27 + $0x92c] ss:$16 sps:$4 sm:$0xff]  }
 0x164   : > { %3583 = vmatpush1.bf16.msra.mxu0 %v5536_v58  ;;  %3927 = vmatpush1.bf16.msra.mxu1 %v5539_v59  ;;  %v5626_v58 = vld [vmem:[%s6354_s27 + $0x920] ss:$16 sps:$4 sm:$0xff]   ;;  %v5629_v59 = vld [vmem:[%s6354_s27 + $0x928] ss:$16 sps:$4 sm:$0xff]  }
 0x165   : > { %3584 = vmatprep.subr.bf16.mxu0 %v5544_v60  ;;  %3928 = vmatprep.subr.bf16.mxu1 %v5547_v61  ;;  %v5634_v60 = vld [vmem:[%s6354_s27 + $0x944] ss:$16 sps:$4 sm:$0xff]   ;;  %v5637_v61 = vld [vmem:[%s6354_s27 + $0x94c] ss:$16 sps:$4 sm:$0xff]  }
 0x168   : > { %3585 = vmatpush1.bf16.msra.mxu0 %v5542_v62  ;;  %3929 = vmatpush1.bf16.msra.mxu1 %v5545_v63  ;;  %v5632_v62 = vld [vmem:[%s6354_s27 + $0x940] ss:$16 sps:$4 sm:$0xff]   ;;  %v5635_v63 = vld [vmem:[%s6354_s27 + $0x948] ss:$16 sps:$4 sm:$0xff]  }
 0x169   : > { %3586 = vmatprep.subr.bf16.mxu0 %v5550_v0  ;;  %3930 = vmatprep.subr.bf16.mxu1 %v5553_v1  ;;  %v5640_v0 = vld [vmem:[%s6354_s27 + $0x964] ss:$16 sps:$4 sm:$0xff]   ;;  %v5643_v1 = vld [vmem:[%s6354_s27 + $0x96c] ss:$16 sps:$4 sm:$0xff]  }
 0x16c   : > { %3587 = vmatpush1.bf16.msra.mxu0 %v5548_v2  ;;  %3931 = vmatpush1.bf16.msra.mxu1 %v5551_v3  ;;  %v5638_v2 = vld [vmem:[%s6354_s27 + $0x960] ss:$16 sps:$4 sm:$0xff]   ;;  %v5641_v3 = vld [vmem:[%s6354_s27 + $0x968] ss:$16 sps:$4 sm:$0xff]  }
 0x16d   : > { %3588 = vmatprep.subr.bf16.mxu0 %v5556_v4  ;;  %3932 = vmatprep.subr.bf16.mxu1 %v5559_v5  ;;  %v5646_v4 = vld [vmem:[%s6354_s27 + $0x984] ss:$16 sps:$4 sm:$0xff]   ;;  %v5649_v5 = vld [vmem:[%s6354_s27 + $0x98c] ss:$16 sps:$4 sm:$0xff]  }
 0x170   : > { %3589 = vmatpush1.bf16.msra.mxu0 %v5554_v6  ;;  %3933 = vmatpush1.bf16.msra.mxu1 %v5557_v7  ;;  %v5644_v6 = vld [vmem:[%s6354_s27 + $0x980] ss:$16 sps:$4 sm:$0xff]   ;;  %v5647_v7 = vld [vmem:[%s6354_s27 + $0x988] ss:$16 sps:$4 sm:$0xff]  }
 0x171   : > { %3590 = vmatprep.subr.bf16.mxu0 %v5562_v8  ;;  %3934 = vmatprep.subr.bf16.mxu1 %v5565_v9  ;;  %v5652_v8 = vld [vmem:[%s6354_s27 + $0x9a4] ss:$16 sps:$4 sm:$0xff]   ;;  %v5655_v9 = vld [vmem:[%s6354_s27 + $0x9ac] ss:$16 sps:$4 sm:$0xff]  }
 0x174   : > { %3591 = vmatpush1.bf16.msra.mxu0 %v5560_v10  ;;  %3935 = vmatpush1.bf16.msra.mxu1 %v5563_v11  ;;  %v5650_v10 = vld [vmem:[%s6354_s27 + $0x9a0] ss:$16 sps:$4 sm:$0xff]   ;;  %v5653_v11 = vld [vmem:[%s6354_s27 + $0x9a8] ss:$16 sps:$4 sm:$0xff]  }
 0x175   : > { %3592 = vmatprep.subr.bf16.mxu0 %v5568_v12  ;;  %3936 = vmatprep.subr.bf16.mxu1 %v5571_v13  ;;  %v5658_v12 = vld [vmem:[%s6354_s27 + $0x9c4] ss:$16 sps:$4 sm:$0xff]   ;;  %v5661_v13 = vld [vmem:[%s6354_s27 + $0x9cc] ss:$16 sps:$4 sm:$0xff]  }
 0x178   : > { %3593 = vmatpush1.bf16.msra.mxu0 %v5566_v14  ;;  %3937 = vmatpush1.bf16.msra.mxu1 %v5569_v17  ;;  %v5656_v14 = vld [vmem:[%s6354_s27 + $0x9c0] ss:$16 sps:$4 sm:$0xff]   ;;  %v5659_v17 = vld [vmem:[%s6354_s27 + $0x9c8] ss:$16 sps:$4 sm:$0xff]  }
 0x179   : > { %3605 = vmatprep.subr.bf16.mxu0 %v5574_v18  ;;  %3949 = vmatprep.subr.bf16.mxu1 %v5577_v21  ;;  %v5664_v18 = vld [vmem:[%s6354_s27 + $0x9e4] ss:$16 sps:$4 sm:$0xff]   ;;  %v5667_v21 = vld [vmem:[%s6354_s27 + $0x9ec] ss:$16 sps:$4 sm:$0xff]  }
 0x17b   : > { %3595 = vmatmul.mubr.bf16.vlgmr.msra.gmra.mrb[0].mxu0 %v4429_v23  ;;  %3939 = vmatmul.mubr.bf16.vlgmr.msra.gmra.mrb[0].mxu1 %v4429_v23  ;;  %v5662_v23 = vld [vmem:[%s6354_s27 + $0x9e0] ss:$16 sps:$4 sm:$0xff]  }
 0x17c   : > { %3606 = vmatpush1.bf16.msra.mxu0 %v5572_v16  ;;  %3950 = vmatpush1.bf16.msra.mxu1 %v5575_v24  ;;  %v5665_v16 = vld [vmem:[%s6354_s27 + $0x9e8] ss:$16 sps:$4 sm:$0xff]   ;;  %v5670_v24 = vld [vmem:[%s6354_s27 + $0xa04] ss:$16 sps:$4 sm:$0xff]  }
 0x17d   : > { %3607 = vmatprep.subr.bf16.mxu0 %v5580_v25  ;;  %3951 = vmatprep.subr.bf16.mxu1 %v5583_v26  ;;  %v5673_v25 = vld [vmem:[%s6354_s27 + $0xa0c] ss:$16 sps:$4 sm:$0xff]  }
 0x17e   : > { %3637 = vmatprep.mubr.bf16.mxu0 %v4432_v27  ;;  %3981 = vmatprep.mubr.bf16.mxu1 %v4432_v27  ;;  %v6715_v26 = vld [vmem:[#allocation2 + $0x28] sm:$0xff] }
 0x17f   : > { %v6717_v27 = vld [vmem:[#allocation2 + $0x68] sm:$0xff] }
 0x180   : > { %3608 = vmatpush1.bf16.msra.mxu0 %v5578_v19  ;;  %3952 = vmatpush1.bf16.msra.mxu1 %v5581_v20  ;;  %v4431_v19 = vcombine.low %v6643_v22, %v6647_v15  ;;  %v5668_v20 = vld [vmem:[%s6354_s27 + $0xa00] ss:$16 sps:$4 sm:$0xff]   ;;  %v5677_v15 = vld [vmem:[%s6354_s27 + $0xa28] ss:$16 sps:$4 sm:$0xff]  }
 0x181   : > { %3609 = vmatprep.subr.bf16.mxu0 %v5586_v28  ;;  %3953 = vmatprep.subr.bf16.mxu1 %v5589_v29  ;;  %v5671_v28 = vld [vmem:[%s6354_s27 + $0xa08] ss:$16 sps:$4 sm:$0xff]   ;;  %v5676_v29 = vld [vmem:[%s6354_s27 + $0xa24] ss:$16 sps:$4 sm:$0xff]   ;;  %v5674_v22 = vld [vmem:[%s6354_s27 + $0xa20] ss:$16 sps:$4 sm:$0xff]  }
 0x184   : > { %3610 = vmatpush1.bf16.msra.mxu0 %v5584_v30  ;;  %3954 = vmatpush1.bf16.msra.mxu1 %v5587_v31  ;;  %v5679_v30 = vld [vmem:[%s6354_s27 + $0xa2c] ss:$16 sps:$4 sm:$0xff]   ;;  %v4434_v31 = vcombine.high %v6715_v26, %v6717_v27 }
 0x185   : > { %3611 = vmatprep.subr.bf16.mxu0 %v5592_v32  ;;  %3955 = vmatprep.subr.bf16.mxu1 %v5595_v33  ;;  %v5682_v32 = vld [vmem:[%s6354_s27 + $0xa44] ss:$16 sps:$4 sm:$0xff]   ;;  %v5685_v33 = vld [vmem:[%s6354_s27 + $0xa4c] ss:$16 sps:$4 sm:$0xff]  }
 0x188   : > { %3612 = vmatpush1.bf16.msra.mxu0 %v5590_v34  ;;  %3956 = vmatpush1.bf16.msra.mxu1 %v5593_v35  ;;  %v5680_v34 = vld [vmem:[%s6354_s27 + $0xa40] ss:$16 sps:$4 sm:$0xff]   ;;  %v5683_v35 = vld [vmem:[%s6354_s27 + $0xa48] ss:$16 sps:$4 sm:$0xff]  }
 0x189   : > { %3613 = vmatprep.subr.bf16.mxu0 %v5598_v36  ;;  %3957 = vmatprep.subr.bf16.mxu1 %v5601_v37  ;;  %v5688_v36 = vld [vmem:[%s6354_s27 + $0xa64] ss:$16 sps:$4 sm:$0xff]   ;;  %v5691_v37 = vld [vmem:[%s6354_s27 + $0xa6c] ss:$16 sps:$4 sm:$0xff]  }
 0x18c   : > { %3614 = vmatpush1.bf16.msra.mxu0 %v5596_v38  ;;  %3958 = vmatpush1.bf16.msra.mxu1 %v5599_v39  ;;  %v5686_v38 = vld [vmem:[%s6354_s27 + $0xa60] ss:$16 sps:$4 sm:$0xff]   ;;  %v5689_v39 = vld [vmem:[%s6354_s27 + $0xa68] ss:$16 sps:$4 sm:$0xff]  }
 0x18d   : > { %3615 = vmatprep.subr.bf16.mxu0 %v5604_v40  ;;  %3959 = vmatprep.subr.bf16.mxu1 %v5607_v41  ;;  %v5694_v40 = vld [vmem:[%s6354_s27 + $0xa84] ss:$16 sps:$4 sm:$0xff]   ;;  %v5697_v41 = vld [vmem:[%s6354_s27 + $0xa8c] ss:$16 sps:$4 sm:$0xff]  }
 0x190   : > { %3616 = vmatpush1.bf16.msra.mxu0 %v5602_v42  ;;  %3960 = vmatpush1.bf16.msra.mxu1 %v5605_v43  ;;  %v5692_v42 = vld [vmem:[%s6354_s27 + $0xa80] ss:$16 sps:$4 sm:$0xff]   ;;  %v5695_v43 = vld [vmem:[%s6354_s27 + $0xa88] ss:$16 sps:$4 sm:$0xff]  }
 0x191   : > { %3617 = vmatprep.subr.bf16.mxu0 %v5610_v44  ;;  %3961 = vmatprep.subr.bf16.mxu1 %v5613_v45  ;;  %v5700_v44 = vld [vmem:[%s6354_s27 + $0xaa4] ss:$16 sps:$4 sm:$0xff]   ;;  %v5703_v45 = vld [vmem:[%s6354_s27 + $0xaac] ss:$16 sps:$4 sm:$0xff]  }
 0x194   : > { %3618 = vmatpush1.bf16.msra.mxu0 %v5608_v46  ;;  %3962 = vmatpush1.bf16.msra.mxu1 %v5611_v47  ;;  %v5698_v46 = vld [vmem:[%s6354_s27 + $0xaa0] ss:$16 sps:$4 sm:$0xff]   ;;  %v5701_v47 = vld [vmem:[%s6354_s27 + $0xaa8] ss:$16 sps:$4 sm:$0xff]  }
 0x195   : > { %3619 = vmatprep.subr.bf16.mxu0 %v5616_v48  ;;  %3963 = vmatprep.subr.bf16.mxu1 %v5619_v49  ;;  %v5706_v48 = vld [vmem:[%s6354_s27 + $0xac4] ss:$16 sps:$4 sm:$0xff]   ;;  %v5709_v49 = vld [vmem:[%s6354_s27 + $0xacc] ss:$16 sps:$4 sm:$0xff]  }
 0x198   : > { %3620 = vmatpush1.bf16.msra.mxu0 %v5614_v50  ;;  %3964 = vmatpush1.bf16.msra.mxu1 %v5617_v51  ;;  %v5704_v50 = vld [vmem:[%s6354_s27 + $0xac0] ss:$16 sps:$4 sm:$0xff]   ;;  %v5707_v51 = vld [vmem:[%s6354_s27 + $0xac8] ss:$16 sps:$4 sm:$0xff]  }
 0x199   : > { %3621 = vmatprep.subr.bf16.mxu0 %v5622_v52  ;;  %3965 = vmatprep.subr.bf16.mxu1 %v5625_v53  ;;  %v5712_v52 = vld [vmem:[%s6354_s27 + $0xae4] ss:$16 sps:$4 sm:$0xff]   ;;  %v5715_v53 = vld [vmem:[%s6354_s27 + $0xaec] ss:$16 sps:$4 sm:$0xff]  }
 0x19c   : > { %3622 = vmatpush1.bf16.msra.mxu0 %v5620_v54  ;;  %3966 = vmatpush1.bf16.msra.mxu1 %v5623_v55  ;;  %v5710_v54 = vld [vmem:[%s6354_s27 + $0xae0] ss:$16 sps:$4 sm:$0xff]   ;;  %v5713_v55 = vld [vmem:[%s6354_s27 + $0xae8] ss:$16 sps:$4 sm:$0xff]  }
 0x19d   : > { %3623 = vmatprep.subr.bf16.mxu0 %v5628_v56  ;;  %3967 = vmatprep.subr.bf16.mxu1 %v5631_v57  ;;  %v5718_v56 = vld [vmem:[%s6354_s27 + $0xb04] ss:$16 sps:$4 sm:$0xff]   ;;  %v5721_v57 = vld [vmem:[%s6354_s27 + $0xb0c] ss:$16 sps:$4 sm:$0xff]  }
 0x1a0   : > { %3624 = vmatpush1.bf16.msra.mxu0 %v5626_v58  ;;  %3968 = vmatpush1.bf16.msra.mxu1 %v5629_v59  ;;  %v5716_v58 = vld [vmem:[%s6354_s27 + $0xb00] ss:$16 sps:$4 sm:$0xff]   ;;  %v5719_v59 = vld [vmem:[%s6354_s27 + $0xb08] ss:$16 sps:$4 sm:$0xff]  }
 0x1a1   : > { %3625 = vmatprep.subr.bf16.mxu0 %v5634_v60  ;;  %3969 = vmatprep.subr.bf16.mxu1 %v5637_v61  ;;  %v5724_v60 = vld [vmem:[%s6354_s27 + $0xb24] ss:$16 sps:$4 sm:$0xff]   ;;  %v5727_v61 = vld [vmem:[%s6354_s27 + $0xb2c] ss:$16 sps:$4 sm:$0xff]  }
 0x1a4   : > { %3626 = vmatpush1.bf16.msra.mxu0 %v5632_v62  ;;  %3970 = vmatpush1.bf16.msra.mxu1 %v5635_v63  ;;  %v5722_v62 = vld [vmem:[%s6354_s27 + $0xb20] ss:$16 sps:$4 sm:$0xff]   ;;  %v5725_v63 = vld [vmem:[%s6354_s27 + $0xb28] ss:$16 sps:$4 sm:$0xff]  }
 0x1a5   : > { %3627 = vmatprep.subr.bf16.mxu0 %v5640_v0  ;;  %3971 = vmatprep.subr.bf16.mxu1 %v5643_v1  ;;  %v5730_v0 = vld [vmem:[%s6354_s27 + $0xb44] ss:$16 sps:$4 sm:$0xff]   ;;  %v5733_v1 = vld [vmem:[%s6354_s27 + $0xb4c] ss:$16 sps:$4 sm:$0xff]  }
 0x1a8   : > { %3628 = vmatpush1.bf16.msra.mxu0 %v5638_v2  ;;  %3972 = vmatpush1.bf16.msra.mxu1 %v5641_v3  ;;  %v5728_v2 = vld [vmem:[%s6354_s27 + $0xb40] ss:$16 sps:$4 sm:$0xff]   ;;  %v5731_v3 = vld [vmem:[%s6354_s27 + $0xb48] ss:$16 sps:$4 sm:$0xff]  }
 0x1a9   : > { %3629 = vmatprep.subr.bf16.mxu0 %v5646_v4  ;;  %3973 = vmatprep.subr.bf16.mxu1 %v5649_v5  ;;  %v5736_v4 = vld [vmem:[%s6354_s27 + $0xb64] ss:$16 sps:$4 sm:$0xff]   ;;  %v5739_v5 = vld [vmem:[%s6354_s27 + $0xb6c] ss:$16 sps:$4 sm:$0xff]  }
 0x1ac   : > { %3630 = vmatpush1.bf16.msra.mxu0 %v5644_v6  ;;  %3974 = vmatpush1.bf16.msra.mxu1 %v5647_v7  ;;  %v5734_v6 = vld [vmem:[%s6354_s27 + $0xb60] ss:$16 sps:$4 sm:$0xff]   ;;  %v5737_v7 = vld [vmem:[%s6354_s27 + $0xb68] ss:$16 sps:$4 sm:$0xff]  }
 0x1ad   : > { %3631 = vmatprep.subr.bf16.mxu0 %v5652_v8  ;;  %3975 = vmatprep.subr.bf16.mxu1 %v5655_v9  ;;  %v5742_v8 = vld [vmem:[%s6354_s27 + $0xb84] ss:$16 sps:$4 sm:$0xff]   ;;  %v5745_v9 = vld [vmem:[%s6354_s27 + $0xb8c] ss:$16 sps:$4 sm:$0xff]  }
 0x1b0   : > { %3632 = vmatpush1.bf16.msra.mxu0 %v5650_v10  ;;  %3976 = vmatpush1.bf16.msra.mxu1 %v5653_v11  ;;  %v5740_v10 = vld [vmem:[%s6354_s27 + $0xb80] ss:$16 sps:$4 sm:$0xff]   ;;  %v5743_v11 = vld [vmem:[%s6354_s27 + $0xb88] ss:$16 sps:$4 sm:$0xff]  }
 0x1b1   : > { %3633 = vmatprep.subr.bf16.mxu0 %v5658_v12  ;;  %3977 = vmatprep.subr.bf16.mxu1 %v5661_v13  ;;  %v5748_v12 = vld [vmem:[%s6354_s27 + $0xba4] ss:$16 sps:$4 sm:$0xff]   ;;  %v5751_v13 = vld [vmem:[%s6354_s27 + $0xbac] ss:$16 sps:$4 sm:$0xff]  }
 0x1b4   : > { %3634 = vmatpush1.bf16.msra.mxu0 %v5656_v14  ;;  %3978 = vmatpush1.bf16.msra.mxu1 %v5659_v17  ;;  %v5746_v14 = vld [vmem:[%s6354_s27 + $0xba0] ss:$16 sps:$4 sm:$0xff]   ;;  %v5749_v17 = vld [vmem:[%s6354_s27 + $0xba8] ss:$16 sps:$4 sm:$0xff]  }
 0x1b5   : > { %3635 = vmatprep.subr.bf16.mxu0 %v5664_v18  ;;  %3979 = vmatprep.subr.bf16.mxu1 %v5667_v21  ;;  %v5754_v18 = vld [vmem:[%s6354_s27 + $0xbc4] ss:$16 sps:$4 sm:$0xff]   ;;  %v5757_v21 = vld [vmem:[%s6354_s27 + $0xbcc] ss:$16 sps:$4 sm:$0xff]  }
 0x1b8   : > { %3636 = vmatpush1.bf16.msra.mxu0 %v5662_v23  ;;  %3980 = vmatpush1.bf16.msra.mxu1 %v5665_v16  ;;  %v5752_v23 = vld [vmem:[%s6354_s27 + $0xbc0] ss:$16 sps:$4 sm:$0xff]   ;;  %v5755_v16 = vld [vmem:[%s6354_s27 + $0xbc8] ss:$16 sps:$4 sm:$0xff]  }
 0x1b9   : > { %3648 = vmatprep.subr.bf16.mxu0 %v5670_v24  ;;  %3992 = vmatprep.subr.bf16.mxu1 %v5673_v25  ;;  %v5760_v24 = vld [vmem:[%s6354_s27 + $0xbe4] ss:$16 sps:$4 sm:$0xff]   ;;  %v5763_v25 = vld [vmem:[%s6354_s27 + $0xbec] ss:$16 sps:$4 sm:$0xff]  }
 0x1bb   : > { %3638 = vmatmul.mubr.bf16.vlgmr.msra.gmra.mrb[0].mxu0 %v4431_v19  ;;  %3982 = vmatmul.mubr.bf16.vlgmr.msra.gmra.mrb[0].mxu1 %v4431_v19  ;;  %v5758_v19 = vld [vmem:[%s6354_s27 + $0xbe0] ss:$16 sps:$4 sm:$0xff]  }
 0x1bc   : > { %3649 = vmatpush1.bf16.msra.mxu0 %v5668_v20  ;;  %3993 = vmatpush1.bf16.msra.mxu1 %v5671_v28  ;;  %v5761_v20 = vld [vmem:[%s6354_s27 + $0xbe8] ss:$16 sps:$4 sm:$0xff]   ;;  %v5766_v28 = vld [vmem:[%s6354_s27 + $0xc04] ss:$16 sps:$4 sm:$0xff]  }
 0x1bd   : > { %3650 = vmatprep.subr.bf16.mxu0 %v5676_v29  ;;  %3994 = vmatprep.subr.bf16.mxu1 %v5679_v30  ;;  %v5769_v29 = vld [vmem:[%s6354_s27 + $0xc0c] ss:$16 sps:$4 sm:$0xff]   ;;  %v4433_v30 = vcombine.low %v6715_v26, %v6717_v27  ;;  %v5770_v27 = vld [vmem:[%s6354_s27 + $0xc20] ss:$16 sps:$4 sm:$0xff]  }
 0x1be   : > { %3680 = vmatprep.mubr.bf16.mxu0 %v4434_v31  ;;  %4024 = vmatprep.mubr.bf16.mxu1 %v4434_v31  ;;  %v6789_v31 = vld [vmem:[#allocation2 + $0x30] sm:$0xff] }
 0x1c0   : > { %3651 = vmatpush1.bf16.msra.mxu0 %v5674_v22  ;;  %3995 = vmatpush1.bf16.msra.mxu1 %v5677_v15  ;;  %v6791_v22 = vld [vmem:[#allocation2 + $0x70] sm:$0xff] }
 0x1c1   : > { %3652 = vmatprep.subr.bf16.mxu0 %v5682_v32  ;;  %3996 = vmatprep.subr.bf16.mxu1 %v5685_v33  ;;  %v5764_v15 = vld [vmem:[%s6354_s27 + $0xc00] ss:$16 sps:$4 sm:$0xff]   ;;  %v5767_v32 = vld [vmem:[%s6354_s27 + $0xc08] ss:$16 sps:$4 sm:$0xff]   ;;  %v5772_v33 = vld [vmem:[%s6354_s27 + $0xc24] ss:$16 sps:$4 sm:$0xff]   ;;  %v4436_v26 = vcombine.high %v6789_v31, %v6791_v22 }
 0x1c4   : > { %3653 = vmatpush1.bf16.msra.mxu0 %v5680_v34  ;;  %3997 = vmatpush1.bf16.msra.mxu1 %v5683_v35  ;;  %v5775_v34 = vld [vmem:[%s6354_s27 + $0xc2c] ss:$16 sps:$4 sm:$0xff]   ;;  %v5773_v35 = vld [vmem:[%s6354_s27 + $0xc28] ss:$16 sps:$4 sm:$0xff]  }
 0x1c5   : > { %3654 = vmatprep.subr.bf16.mxu0 %v5688_v36  ;;  %3998 = vmatprep.subr.bf16.mxu1 %v5691_v37  ;;  %v5778_v36 = vld [vmem:[%s6354_s27 + $0xc44] ss:$16 sps:$4 sm:$0xff]   ;;  %v5781_v37 = vld [vmem:[%s6354_s27 + $0xc4c] ss:$16 sps:$4 sm:$0xff]  }
 0x1c8   : > { %3655 = vmatpush1.bf16.msra.mxu0 %v5686_v38  ;;  %3999 = vmatpush1.bf16.msra.mxu1 %v5689_v39  ;;  %v5776_v38 = vld [vmem:[%s6354_s27 + $0xc40] ss:$16 sps:$4 sm:$0xff]   ;;  %v5779_v39 = vld [vmem:[%s6354_s27 + $0xc48] ss:$16 sps:$4 sm:$0xff]  }
 0x1c9   : > { %3656 = vmatprep.subr.bf16.mxu0 %v5694_v40  ;;  %4000 = vmatprep.subr.bf16.mxu1 %v5697_v41  ;;  %v5784_v40 = vld [vmem:[%s6354_s27 + $0xc64] ss:$16 sps:$4 sm:$0xff]   ;;  %v5787_v41 = vld [vmem:[%s6354_s27 + $0xc6c] ss:$16 sps:$4 sm:$0xff]  }
 0x1cc   : > { %3657 = vmatpush1.bf16.msra.mxu0 %v5692_v42  ;;  %4001 = vmatpush1.bf16.msra.mxu1 %v5695_v43  ;;  %v5782_v42 = vld [vmem:[%s6354_s27 + $0xc60] ss:$16 sps:$4 sm:$0xff]   ;;  %v5785_v43 = vld [vmem:[%s6354_s27 + $0xc68] ss:$16 sps:$4 sm:$0xff]  }
 0x1cd   : > { %3658 = vmatprep.subr.bf16.mxu0 %v5700_v44  ;;  %4002 = vmatprep.subr.bf16.mxu1 %v5703_v45  ;;  %v5790_v44 = vld [vmem:[%s6354_s27 + $0xc84] ss:$16 sps:$4 sm:$0xff]   ;;  %v5793_v45 = vld [vmem:[%s6354_s27 + $0xc8c] ss:$16 sps:$4 sm:$0xff]  }
 0x1d0   : > { %3659 = vmatpush1.bf16.msra.mxu0 %v5698_v46  ;;  %4003 = vmatpush1.bf16.msra.mxu1 %v5701_v47  ;;  %v5788_v46 = vld [vmem:[%s6354_s27 + $0xc80] ss:$16 sps:$4 sm:$0xff]   ;;  %v5791_v47 = vld [vmem:[%s6354_s27 + $0xc88] ss:$16 sps:$4 sm:$0xff]  }
 0x1d1   : > { %3660 = vmatprep.subr.bf16.mxu0 %v5706_v48  ;;  %4004 = vmatprep.subr.bf16.mxu1 %v5709_v49  ;;  %v5796_v48 = vld [vmem:[%s6354_s27 + $0xca4] ss:$16 sps:$4 sm:$0xff]   ;;  %v5799_v49 = vld [vmem:[%s6354_s27 + $0xcac] ss:$16 sps:$4 sm:$0xff]  }
 0x1d4   : > { %3661 = vmatpush1.bf16.msra.mxu0 %v5704_v50  ;;  %4005 = vmatpush1.bf16.msra.mxu1 %v5707_v51  ;;  %v5794_v50 = vld [vmem:[%s6354_s27 + $0xca0] ss:$16 sps:$4 sm:$0xff]   ;;  %v5797_v51 = vld [vmem:[%s6354_s27 + $0xca8] ss:$16 sps:$4 sm:$0xff]  }
 0x1d5   : > { %3662 = vmatprep.subr.bf16.mxu0 %v5712_v52  ;;  %4006 = vmatprep.subr.bf16.mxu1 %v5715_v53  ;;  %v5802_v52 = vld [vmem:[%s6354_s27 + $0xcc4] ss:$16 sps:$4 sm:$0xff]   ;;  %v5805_v53 = vld [vmem:[%s6354_s27 + $0xccc] ss:$16 sps:$4 sm:$0xff]  }
 0x1d8   : > { %3663 = vmatpush1.bf16.msra.mxu0 %v5710_v54  ;;  %4007 = vmatpush1.bf16.msra.mxu1 %v5713_v55  ;;  %v5800_v54 = vld [vmem:[%s6354_s27 + $0xcc0] ss:$16 sps:$4 sm:$0xff]   ;;  %v5803_v55 = vld [vmem:[%s6354_s27 + $0xcc8] ss:$16 sps:$4 sm:$0xff]  }
 0x1d9   : > { %3664 = vmatprep.subr.bf16.mxu0 %v5718_v56  ;;  %4008 = vmatprep.subr.bf16.mxu1 %v5721_v57  ;;  %v5808_v56 = vld [vmem:[%s6354_s27 + $0xce4] ss:$16 sps:$4 sm:$0xff]   ;;  %v5811_v57 = vld [vmem:[%s6354_s27 + $0xcec] ss:$16 sps:$4 sm:$0xff]  }
 0x1dc   : > { %3665 = vmatpush1.bf16.msra.mxu0 %v5716_v58  ;;  %4009 = vmatpush1.bf16.msra.mxu1 %v5719_v59  ;;  %v5806_v58 = vld [vmem:[%s6354_s27 + $0xce0] ss:$16 sps:$4 sm:$0xff]   ;;  %v5809_v59 = vld [vmem:[%s6354_s27 + $0xce8] ss:$16 sps:$4 sm:$0xff]  }
 0x1dd   : > { %3666 = vmatprep.subr.bf16.mxu0 %v5724_v60  ;;  %4010 = vmatprep.subr.bf16.mxu1 %v5727_v61  ;;  %v5814_v60 = vld [vmem:[%s6354_s27 + $0xd04] ss:$16 sps:$4 sm:$0xff]   ;;  %v5817_v61 = vld [vmem:[%s6354_s27 + $0xd0c] ss:$16 sps:$4 sm:$0xff]  }
 0x1e0   : > { %3667 = vmatpush1.bf16.msra.mxu0 %v5722_v62  ;;  %4011 = vmatpush1.bf16.msra.mxu1 %v5725_v63  ;;  %v5812_v62 = vld [vmem:[%s6354_s27 + $0xd00] ss:$16 sps:$4 sm:$0xff]   ;;  %v5815_v63 = vld [vmem:[%s6354_s27 + $0xd08] ss:$16 sps:$4 sm:$0xff]  }
 0x1e1   : > { %3668 = vmatprep.subr.bf16.mxu0 %v5730_v0  ;;  %4012 = vmatprep.subr.bf16.mxu1 %v5733_v1  ;;  %v5820_v0 = vld [vmem:[%s6354_s27 + $0xd24] ss:$16 sps:$4 sm:$0xff]   ;;  %v5823_v1 = vld [vmem:[%s6354_s27 + $0xd2c] ss:$16 sps:$4 sm:$0xff]  }
 0x1e4   : > { %3669 = vmatpush1.bf16.msra.mxu0 %v5728_v2  ;;  %4013 = vmatpush1.bf16.msra.mxu1 %v5731_v3  ;;  %v5818_v2 = vld [vmem:[%s6354_s27 + $0xd20] ss:$16 sps:$4 sm:$0xff]   ;;  %v5821_v3 = vld [vmem:[%s6354_s27 + $0xd28] ss:$16 sps:$4 sm:$0xff]  }
 0x1e5   : > { %3670 = vmatprep.subr.bf16.mxu0 %v5736_v4  ;;  %4014 = vmatprep.subr.bf16.mxu1 %v5739_v5  ;;  %v5826_v4 = vld [vmem:[%s6354_s27 + $0xd44] ss:$16 sps:$4 sm:$0xff]   ;;  %v5829_v5 = vld [vmem:[%s6354_s27 + $0xd4c] ss:$16 sps:$4 sm:$0xff]  }
 0x1e8   : > { %3671 = vmatpush1.bf16.msra.mxu0 %v5734_v6  ;;  %4015 = vmatpush1.bf16.msra.mxu1 %v5737_v7  ;;  %v5824_v6 = vld [vmem:[%s6354_s27 + $0xd40] ss:$16 sps:$4 sm:$0xff]   ;;  %v5827_v7 = vld [vmem:[%s6354_s27 + $0xd48] ss:$16 sps:$4 sm:$0xff]  }
 0x1e9   : > { %3672 = vmatprep.subr.bf16.mxu0 %v5742_v8  ;;  %4016 = vmatprep.subr.bf16.mxu1 %v5745_v9  ;;  %v5832_v8 = vld [vmem:[%s6354_s27 + $0xd64] ss:$16 sps:$4 sm:$0xff]   ;;  %v5835_v9 = vld [vmem:[%s6354_s27 + $0xd6c] ss:$16 sps:$4 sm:$0xff]  }
 0x1ec   : > { %3673 = vmatpush1.bf16.msra.mxu0 %v5740_v10  ;;  %4017 = vmatpush1.bf16.msra.mxu1 %v5743_v11  ;;  %v5830_v10 = vld [vmem:[%s6354_s27 + $0xd60] ss:$16 sps:$4 sm:$0xff]   ;;  %v5833_v11 = vld [vmem:[%s6354_s27 + $0xd68] ss:$16 sps:$4 sm:$0xff]  }
 0x1ed   : > { %3674 = vmatprep.subr.bf16.mxu0 %v5748_v12  ;;  %4018 = vmatprep.subr.bf16.mxu1 %v5751_v13  ;;  %v5838_v12 = vld [vmem:[%s6354_s27 + $0xd84] ss:$16 sps:$4 sm:$0xff]   ;;  %v5841_v13 = vld [vmem:[%s6354_s27 + $0xd8c] ss:$16 sps:$4 sm:$0xff]  }
 0x1f0   : > { %3675 = vmatpush1.bf16.msra.mxu0 %v5746_v14  ;;  %4019 = vmatpush1.bf16.msra.mxu1 %v5749_v17  ;;  %v5836_v14 = vld [vmem:[%s6354_s27 + $0xd80] ss:$16 sps:$4 sm:$0xff]   ;;  %v5839_v17 = vld [vmem:[%s6354_s27 + $0xd88] ss:$16 sps:$4 sm:$0xff]  }
 0x1f1   : > { %3676 = vmatprep.subr.bf16.mxu0 %v5754_v18  ;;  %4020 = vmatprep.subr.bf16.mxu1 %v5757_v21  ;;  %v5844_v18 = vld [vmem:[%s6354_s27 + $0xda4] ss:$16 sps:$4 sm:$0xff]   ;;  %v5847_v21 = vld [vmem:[%s6354_s27 + $0xdac] ss:$16 sps:$4 sm:$0xff]  }
 0x1f4   : > { %3677 = vmatpush1.bf16.msra.mxu0 %v5752_v23  ;;  %4021 = vmatpush1.bf16.msra.mxu1 %v5755_v16  ;;  %v5842_v23 = vld [vmem:[%s6354_s27 + $0xda0] ss:$16 sps:$4 sm:$0xff]   ;;  %v5845_v16 = vld [vmem:[%s6354_s27 + $0xda8] ss:$16 sps:$4 sm:$0xff]  }
 0x1f5   : > { %3678 = vmatprep.subr.bf16.mxu0 %v5760_v24  ;;  %4022 = vmatprep.subr.bf16.mxu1 %v5763_v25  ;;  %v5850_v24 = vld [vmem:[%s6354_s27 + $0xdc4] ss:$16 sps:$4 sm:$0xff]   ;;  %v5853_v25 = vld [vmem:[%s6354_s27 + $0xdcc] ss:$16 sps:$4 sm:$0xff]  }
 0x1f8   : > { %3679 = vmatpush1.bf16.msra.mxu0 %v5758_v19  ;;  %4023 = vmatpush1.bf16.msra.mxu1 %v5761_v20  ;;  %v5848_v19 = vld [vmem:[%s6354_s27 + $0xdc0] ss:$16 sps:$4 sm:$0xff]   ;;  %v5851_v20 = vld [vmem:[%s6354_s27 + $0xdc8] ss:$16 sps:$4 sm:$0xff]  }
 0x1f9   : > { %3691 = vmatprep.subr.bf16.mxu0 %v5766_v28  ;;  %4035 = vmatprep.subr.bf16.mxu1 %v5769_v29  ;;  %v5856_v28 = vld [vmem:[%s6354_s27 + $0xde4] ss:$16 sps:$4 sm:$0xff]   ;;  %v5859_v29 = vld [vmem:[%s6354_s27 + $0xdec] ss:$16 sps:$4 sm:$0xff]  }
 0x1fb   : > { %3681 = vmatmul.mubr.bf16.vlgmr.msra.gmra.mrb[0].mxu0 %v4433_v30  ;;  %4025 = vmatmul.mubr.bf16.vlgmr.msra.gmra.mrb[0].mxu1 %v4433_v30  ;;  %v5854_v30 = vld [vmem:[%s6354_s27 + $0xde0] ss:$16 sps:$4 sm:$0xff]  }
 0x1fc   : > { %3692 = vmatpush1.bf16.msra.mxu0 %v5764_v15  ;;  %4036 = vmatpush1.bf16.msra.mxu1 %v5767_v32  ;;  %v5857_v15 = vld [vmem:[%s6354_s27 + $0xde8] ss:$16 sps:$4 sm:$0xff]   ;;  %v5862_v32 = vld [vmem:[%s6354_s27 + $0xe04] ss:$16 sps:$4 sm:$0xff]  }
 0x1fd   : > { %3693 = vmatprep.subr.bf16.mxu0 %v5772_v33  ;;  %4037 = vmatprep.subr.bf16.mxu1 %v5775_v34  ;;  %v5865_v33 = vld [vmem:[%s6354_s27 + $0xe0c] ss:$16 sps:$4 sm:$0xff]   ;;  %v4435_v34 = vcombine.low %v6789_v31, %v6791_v22  ;;  %v5866_v22 = vld [vmem:[%s6354_s27 + $0xe20] ss:$16 sps:$4 sm:$0xff]  }
 0x1fe   : > { %3723 = vmatprep.mubr.bf16.mxu0 %v4436_v26  ;;  %4067 = vmatprep.mubr.bf16.mxu1 %v4436_v26  ;;  %v6861_v26 = vld [vmem:[#allocation2 + $0x38] sm:$0xff] }
 0x200   : > { %3694 = vmatpush1.bf16.msra.mxu0 %v5770_v27  ;;  %4038 = vmatpush1.bf16.msra.mxu1 %v5773_v35  ;;  %v6863_v27 = vld [vmem:[#allocation2 + $0x78] sm:$0xff]  ;;  %v5860_v35 = vld [vmem:[%s6354_s27 + $0xe00] ss:$16 sps:$4 sm:$0xff]  }
 0x201   : > { %3695 = vmatprep.subr.bf16.mxu0 %v5778_v36  ;;  %4039 = vmatprep.subr.bf16.mxu1 %v5781_v37  ;;  %v5863_v36 = vld [vmem:[%s6354_s27 + $0xe08] ss:$16 sps:$4 sm:$0xff]   ;;  %v5868_v37 = vld [vmem:[%s6354_s27 + $0xe24] ss:$16 sps:$4 sm:$0xff]   ;;  %v4438_v31 = vcombine.high %v6861_v26, %v6863_v27 }
 0x204   : > { %3696 = vmatpush1.bf16.msra.mxu0 %v5776_v38  ;;  %4040 = vmatpush1.bf16.msra.mxu1 %v5779_v39  ;;  %v5871_v38 = vld [vmem:[%s6354_s27 + $0xe2c] ss:$16 sps:$4 sm:$0xff]   ;;  %v5869_v39 = vld [vmem:[%s6354_s27 + $0xe28] ss:$16 sps:$4 sm:$0xff]  }
 0x205   : > { %3697 = vmatprep.subr.bf16.mxu0 %v5784_v40  ;;  %4041 = vmatprep.subr.bf16.mxu1 %v5787_v41  ;;  %v5874_v40 = vld [vmem:[%s6354_s27 + $0xe44] ss:$16 sps:$4 sm:$0xff]   ;;  %v5877_v41 = vld [vmem:[%s6354_s27 + $0xe4c] ss:$16 sps:$4 sm:$0xff]  }
 0x208   : > { %3698 = vmatpush1.bf16.msra.mxu0 %v5782_v42  ;;  %4042 = vmatpush1.bf16.msra.mxu1 %v5785_v43  ;;  %v5872_v42 = vld [vmem:[%s6354_s27 + $0xe40] ss:$16 sps:$4 sm:$0xff]   ;;  %v5875_v43 = vld [vmem:[%s6354_s27 + $0xe48] ss:$16 sps:$4 sm:$0xff]  }
 0x209   : > { %3699 = vmatprep.subr.bf16.mxu0 %v5790_v44  ;;  %4043 = vmatprep.subr.bf16.mxu1 %v5793_v45  ;;  %v5880_v44 = vld [vmem:[%s6354_s27 + $0xe64] ss:$16 sps:$4 sm:$0xff]   ;;  %v5883_v45 = vld [vmem:[%s6354_s27 + $0xe6c] ss:$16 sps:$4 sm:$0xff]  }
 0x20c   : > { %3700 = vmatpush1.bf16.msra.mxu0 %v5788_v46  ;;  %4044 = vmatpush1.bf16.msra.mxu1 %v5791_v47  ;;  %v5878_v46 = vld [vmem:[%s6354_s27 + $0xe60] ss:$16 sps:$4 sm:$0xff]   ;;  %v5881_v47 = vld [vmem:[%s6354_s27 + $0xe68] ss:$16 sps:$4 sm:$0xff]  }
 0x20d   : > { %3701 = vmatprep.subr.bf16.mxu0 %v5796_v48  ;;  %4045 = vmatprep.subr.bf16.mxu1 %v5799_v49  ;;  %v5886_v48 = vld [vmem:[%s6354_s27 + $0xe84] ss:$16 sps:$4 sm:$0xff]   ;;  %v5889_v49 = vld [vmem:[%s6354_s27 + $0xe8c] ss:$16 sps:$4 sm:$0xff]  }
 0x210   : > { %3702 = vmatpush1.bf16.msra.mxu0 %v5794_v50  ;;  %4046 = vmatpush1.bf16.msra.mxu1 %v5797_v51  ;;  %v5884_v50 = vld [vmem:[%s6354_s27 + $0xe80] ss:$16 sps:$4 sm:$0xff]   ;;  %v5887_v51 = vld [vmem:[%s6354_s27 + $0xe88] ss:$16 sps:$4 sm:$0xff]  }
 0x211   : > { %3703 = vmatprep.subr.bf16.mxu0 %v5802_v52  ;;  %4047 = vmatprep.subr.bf16.mxu1 %v5805_v53  ;;  %v5892_v52 = vld [vmem:[%s6354_s27 + $0xea4] ss:$16 sps:$4 sm:$0xff]   ;;  %v5895_v53 = vld [vmem:[%s6354_s27 + $0xeac] ss:$16 sps:$4 sm:$0xff]  }
 0x214   : > { %3704 = vmatpush1.bf16.msra.mxu0 %v5800_v54  ;;  %4048 = vmatpush1.bf16.msra.mxu1 %v5803_v55  ;;  %v5890_v54 = vld [vmem:[%s6354_s27 + $0xea0] ss:$16 sps:$4 sm:$0xff]   ;;  %v5893_v55 = vld [vmem:[%s6354_s27 + $0xea8] ss:$16 sps:$4 sm:$0xff]  }
 0x215   : > { %3705 = vmatprep.subr.bf16.mxu0 %v5808_v56  ;;  %4049 = vmatprep.subr.bf16.mxu1 %v5811_v57  ;;  %v5898_v56 = vld [vmem:[%s6354_s27 + $0xec4] ss:$16 sps:$4 sm:$0xff]   ;;  %v5901_v57 = vld [vmem:[%s6354_s27 + $0xecc] ss:$16 sps:$4 sm:$0xff]  }
 0x218   : > { %3706 = vmatpush1.bf16.msra.mxu0 %v5806_v58  ;;  %4050 = vmatpush1.bf16.msra.mxu1 %v5809_v59  ;;  %v5896_v58 = vld [vmem:[%s6354_s27 + $0xec0] ss:$16 sps:$4 sm:$0xff]   ;;  %v5899_v59 = vld [vmem:[%s6354_s27 + $0xec8] ss:$16 sps:$4 sm:$0xff]  }
 0x219   : > { %3707 = vmatprep.subr.bf16.mxu0 %v5814_v60  ;;  %4051 = vmatprep.subr.bf16.mxu1 %v5817_v61  ;;  %v5904_v60 = vld [vmem:[%s6354_s27 + $0xee4] ss:$16 sps:$4 sm:$0xff]   ;;  %v5907_v61 = vld [vmem:[%s6354_s27 + $0xeec] ss:$16 sps:$4 sm:$0xff]  }
 0x21c   : > { %3708 = vmatpush1.bf16.msra.mxu0 %v5812_v62  ;;  %4052 = vmatpush1.bf16.msra.mxu1 %v5815_v63  ;;  %v5902_v62 = vld [vmem:[%s6354_s27 + $0xee0] ss:$16 sps:$4 sm:$0xff]   ;;  %v5905_v63 = vld [vmem:[%s6354_s27 + $0xee8] ss:$16 sps:$4 sm:$0xff]  }
 0x21d   : > { %3709 = vmatprep.subr.bf16.mxu0 %v5820_v0  ;;  %4053 = vmatprep.subr.bf16.mxu1 %v5823_v1  ;;  %v5910_v0 = vld [vmem:[%s6354_s27 + $0xf04] ss:$16 sps:$4 sm:$0xff]   ;;  %v5913_v1 = vld [vmem:[%s6354_s27 + $0xf0c] ss:$16 sps:$4 sm:$0xff]  }
 0x220   : > { %3710 = vmatpush1.bf16.msra.mxu0 %v5818_v2  ;;  %4054 = vmatpush1.bf16.msra.mxu1 %v5821_v3  ;;  %v5908_v2 = vld [vmem:[%s6354_s27 + $0xf00] ss:$16 sps:$4 sm:$0xff]   ;;  %v5911_v3 = vld [vmem:[%s6354_s27 + $0xf08] ss:$16 sps:$4 sm:$0xff]  }
 0x221   : > { %3711 = vmatprep.subr.bf16.mxu0 %v5826_v4  ;;  %4055 = vmatprep.subr.bf16.mxu1 %v5829_v5  ;;  %v5916_v4 = vld [vmem:[%s6354_s27 + $0xf24] ss:$16 sps:$4 sm:$0xff]   ;;  %v5919_v5 = vld [vmem:[%s6354_s27 + $0xf2c] ss:$16 sps:$4 sm:$0xff]  }
 0x224   : > { %3712 = vmatpush1.bf16.msra.mxu0 %v5824_v6  ;;  %4056 = vmatpush1.bf16.msra.mxu1 %v5827_v7  ;;  %v5914_v6 = vld [vmem:[%s6354_s27 + $0xf20] ss:$16 sps:$4 sm:$0xff]   ;;  %v5917_v7 = vld [vmem:[%s6354_s27 + $0xf28] ss:$16 sps:$4 sm:$0xff]  }
 0x225   : > { %3713 = vmatprep.subr.bf16.mxu0 %v5832_v8  ;;  %4057 = vmatprep.subr.bf16.mxu1 %v5835_v9  ;;  %v5922_v8 = vld [vmem:[%s6354_s27 + $0xf44] ss:$16 sps:$4 sm:$0xff]   ;;  %v5925_v9 = vld [vmem:[%s6354_s27 + $0xf4c] ss:$16 sps:$4 sm:$0xff]  }
 0x228   : > { %3714 = vmatpush1.bf16.msra.mxu0 %v5830_v10  ;;  %4058 = vmatpush1.bf16.msra.mxu1 %v5833_v11  ;;  %v5920_v10 = vld [vmem:[%s6354_s27 + $0xf40] ss:$16 sps:$4 sm:$0xff]   ;;  %v5923_v11 = vld [vmem:[%s6354_s27 + $0xf48] ss:$16 sps:$4 sm:$0xff]  }
 0x229   : > { %3715 = vmatprep.subr.bf16.mxu0 %v5838_v12  ;;  %4059 = vmatprep.subr.bf16.mxu1 %v5841_v13  ;;  %v5928_v12 = vld [vmem:[%s6354_s27 + $0xf64] ss:$16 sps:$4 sm:$0xff]   ;;  %v5931_v13 = vld [vmem:[%s6354_s27 + $0xf6c] ss:$16 sps:$4 sm:$0xff]  }
 0x22c   : > { %3716 = vmatpush1.bf16.msra.mxu0 %v5836_v14  ;;  %4060 = vmatpush1.bf16.msra.mxu1 %v5839_v17  ;;  %v5926_v14 = vld [vmem:[%s6354_s27 + $0xf60] ss:$16 sps:$4 sm:$0xff]   ;;  %v5929_v17 = vld [vmem:[%s6354_s27 + $0xf68] ss:$16 sps:$4 sm:$0xff]  }
 0x22d   : > { %3717 = vmatprep.subr.bf16.mxu0 %v5844_v18  ;;  %4061 = vmatprep.subr.bf16.mxu1 %v5847_v21  ;;  %v5934_v18 = vld [vmem:[%s6354_s27 + $0xf84] ss:$16 sps:$4 sm:$0xff]   ;;  %v5937_v21 = vld [vmem:[%s6354_s27 + $0xf8c] ss:$16 sps:$4 sm:$0xff]  }
 0x230   : > { %3718 = vmatpush1.bf16.msra.mxu0 %v5842_v23  ;;  %4062 = vmatpush1.bf16.msra.mxu1 %v5845_v16  ;;  %v5932_v23 = vld [vmem:[%s6354_s27 + $0xf80] ss:$16 sps:$4 sm:$0xff]   ;;  %v5935_v16 = vld [vmem:[%s6354_s27 + $0xf88] ss:$16 sps:$4 sm:$0xff]  }
 0x231   : > { %3719 = vmatprep.subr.bf16.mxu0 %v5850_v24  ;;  %4063 = vmatprep.subr.bf16.mxu1 %v5853_v25  ;;  %v5940_v24 = vld [vmem:[%s6354_s27 + $0xfa4] ss:$16 sps:$4 sm:$0xff]   ;;  %v5943_v25 = vld [vmem:[%s6354_s27 + $0xfac] ss:$16 sps:$4 sm:$0xff]  }
 0x234   : > { %3720 = vmatpush1.bf16.msra.mxu0 %v5848_v19  ;;  %4064 = vmatpush1.bf16.msra.mxu1 %v5851_v20  ;;  %v5938_v19 = vld [vmem:[%s6354_s27 + $0xfa0] ss:$16 sps:$4 sm:$0xff]   ;;  %v5941_v20 = vld [vmem:[%s6354_s27 + $0xfa8] ss:$16 sps:$4 sm:$0xff]  }
 0x235   : > { %3721 = vmatprep.subr.bf16.mxu0 %v5856_v28  ;;  %4065 = vmatprep.subr.bf16.mxu1 %v5859_v29  ;;  %v5946_v28 = vld [vmem:[%s6354_s27 + $0xfc4] ss:$16 sps:$4 sm:$0xff]   ;;  %v5949_v29 = vld [vmem:[%s6354_s27 + $0xfcc] ss:$16 sps:$4 sm:$0xff]  }
 0x238   : > { %3722 = vmatpush1.bf16.msra.mxu0 %v5854_v30  ;;  %4066 = vmatpush1.bf16.msra.mxu1 %v5857_v15  ;;  %v5944_v30 = vld [vmem:[%s6354_s27 + $0xfc0] ss:$16 sps:$4 sm:$0xff]   ;;  %v5947_v15 = vld [vmem:[%s6354_s27 + $0xfc8] ss:$16 sps:$4 sm:$0xff]  }
 0x239   : > { %3734 = vmatprep.subr.bf16.mxu0 %v5862_v32  ;;  %4078 = vmatprep.subr.bf16.mxu1 %v5865_v33  ;;  %v5952_v32 = vld [vmem:[%s6354_s27 + $0xfe4] ss:$16 sps:$4 sm:$0xff]   ;;  %v5955_v33 = vld [vmem:[%s6354_s27 + $0xfec] ss:$16 sps:$4 sm:$0xff]  }
 0x23b   : > { %3724 = vmatmul.mubr.bf16.vlgmr.msra.gmra.mrb[0].mxu0 %v4435_v34  ;;  %4068 = vmatmul.mubr.bf16.vlgmr.msra.gmra.mrb[0].mxu1 %v4435_v34  ;;  %v4151_v34 = vld [vmem:[%s6360_s5 + $0x80] sm:$0xff] }
 0x23c   : > { %3735 = vmatpush1.bf16.msra.mxu0 %v5860_v35  ;;  %4079 = vmatpush1.bf16.msra.mxu1 %v5863_v36  ;;  %v4152_v35 = vld [vmem:[%s6360_s5 + $0x88] sm:$0xff]  ;;  %v5950_v36 = vld [vmem:[%s6354_s27 + $0xfe0] ss:$16 sps:$4 sm:$0xff]  }
 0x23d   : > { %3736 = vmatprep.subr.bf16.mxu0 %v5868_v37  ;;  %4080 = vmatprep.subr.bf16.mxu1 %v5871_v38  ;;  %v5953_v37 = vld [vmem:[%s6354_s27 + $0xfe8] ss:$16 sps:$4 sm:$0xff]   ;;  %v4996_v38 = vpack.c.bf16 %v4152_v35, %v4151_v34 }
 0x23e   : > { %3766 = vmatprep.mubr.bf16.mxu0 %v4438_v31  ;;  %4110 = vmatprep.mubr.bf16.mxu1 %v4438_v31  ;;  %v4135_v31 = vld [vmem:[%s6360_s5] sm:$0xff] }
 0x240   : > { %3737 = vmatpush1.bf16.msra.mxu0 %v5866_v22  ;;  %4081 = vmatpush1.bf16.msra.mxu1 %v5869_v39  ;;  %v4136_v22 = vld [vmem:[%s6360_s5 + $0x8] sm:$0xff]  ;;  %v4153_v39 = vld [vmem:[%s6360_s5 + $0x90] sm:$0xff] }
 0x241   : > { %3738 = vmatprep.subr.bf16.mxu0 %v5874_v40  ;;  %4082 = vmatprep.subr.bf16.mxu1 %v5877_v41  ;;  %v4154_v40 = vld [vmem:[%s6360_s5 + $0x98] sm:$0xff]  ;;  %v4437_v41 = vcombine.low %v6861_v26, %v6863_v27 }
 0x244   : > { %3739 = vmatpush1.bf16.msra.mxu0 %v5872_v42  ;;  %4083 = vmatpush1.bf16.msra.mxu1 %v5875_v43  ;;  %v4998_v42 = vpack.c.bf16 %v4136_v22, %v4135_v31  ;;  %v5000_v43 = vpack.c.bf16 %v4154_v40, %v4153_v39  ;;  %v4133_v40 = vld [vmem:[#allocation8] sm:$0xff] }
 0x245   : > { %3740 = vmatprep.subr.bf16.mxu0 %v5880_v44  ;;  %4084 = vmatprep.subr.bf16.mxu1 %v5883_v45  ;;  %v4137_v44 = vld [vmem:[%s6360_s5 + $0x10] sm:$0xff]  ;;  %v4138_v45 = vld [vmem:[%s6360_s5 + $0x18] sm:$0xff] }
 0x246   : > { %v5002_v26 = vpack.c.bf16 %v4138_v45, %v4137_v44  ;;  %v4134_v44 = vld [vmem:[#allocation8 + $0x8] sm:$0xff] }
 0x248   : > { %3741 = vmatpush1.bf16.msra.mxu0 %v5878_v46  ;;  %4085 = vmatpush1.bf16.msra.mxu1 %v5881_v47  ;;  %v4155_v46 = vld [vmem:[%s6360_s5 + $0xa0] sm:$0xff]  ;;  %v4156_v47 = vld [vmem:[%s6360_s5 + $0xa8] sm:$0xff] }
 0x249   : > { %3742 = vmatprep.subr.bf16.mxu0 %v5886_v48  ;;  %4086 = vmatprep.subr.bf16.mxu1 %v5889_v49  ;;  %v5004_v27 = vpack.c.bf16 %v4156_v47, %v4155_v46  ;;  %v4139_v48 = vld [vmem:[%s6360_s5 + $0x20] sm:$0xff]  ;;  %v4140_v49 = vld [vmem:[%s6360_s5 + $0x28] sm:$0xff] }
 0x24c   : > { %3743 = vmatpush1.bf16.msra.mxu0 %v5884_v50  ;;  %4087 = vmatpush1.bf16.msra.mxu1 %v5887_v51  ;;  %v4157_v50 = vld [vmem:[%s6360_s5 + $0xb0] sm:$0xff]  ;;  %v4158_v51 = vld [vmem:[%s6360_s5 + $0xb8] sm:$0xff] }
 0x24d   : > { %3744 = vmatprep.subr.bf16.mxu0 %v5892_v52  ;;  %4088 = vmatprep.subr.bf16.mxu1 %v5895_v53  ;;  %v5006_v52 = vpack.c.bf16 %v4140_v49, %v4139_v48  ;;  %v5008_v53 = vpack.c.bf16 %v4158_v51, %v4157_v50  ;;  %v4256_v49 = vlaneseq (!%p4951_p0) }
 0x24f   : > { %v4257_v50 = vand.u32 (!%p4951_p0), 127, %v4256_v49 }
 0x250   : > { %3745 = vmatpush1.bf16.msra.mxu0 %v5890_v54  ;;  %4089 = vmatpush1.bf16.msra.mxu1 %v5893_v55  ;;  %v4141_v54 = vld [vmem:[%s6360_s5 + $0x30] sm:$0xff]  ;;  %v4142_v55 = vld [vmem:[%s6360_s5 + $0x38] sm:$0xff] }
 0x251   : > { %3746 = vmatprep.subr.bf16.mxu0 %v5898_v56  ;;  %4090 = vmatprep.subr.bf16.mxu1 %v5901_v57  ;;  %v4159_v56 = vld [vmem:[%s6360_s5 + $0xc0] sm:$0xff]  ;;  %v4160_v57 = vld [vmem:[%s6360_s5 + $0xc8] sm:$0xff]  ;;  %vm4258_vm0 = vcmp.lt.s32.totalorder (!%p4951_p0), %v4257_v50, 80 }
 0x254   : > { %3747 = vmatpush1.bf16.msra.mxu0 %v5896_v58  ;;  %4091 = vmatpush1.bf16.msra.mxu1 %v5899_v59  ;;  %v5010_v58 = vpack.c.bf16 %v4142_v55, %v4141_v54  ;;  %v5012_v59 = vpack.c.bf16 %v4160_v57, %v4159_v56 }
 0x255   : > { %3748 = vmatprep.subr.bf16.mxu0 %v5904_v60  ;;  %4092 = vmatprep.subr.bf16.mxu1 %v5907_v61  ;;  %v4143_v60 = vld [vmem:[%s6360_s5 + $0x40] sm:$0xff]  ;;  %v4144_v61 = vld [vmem:[%s6360_s5 + $0x48] sm:$0xff] }
 0x258   : > { %3749 = vmatpush1.bf16.msra.mxu0 %v5902_v62  ;;  %4093 = vmatpush1.bf16.msra.mxu1 %v5905_v63  ;;  %v4161_v62 = vld [vmem:[%s6360_s5 + $0xd0] sm:$0xff]  ;;  %v4162_v63 = vld [vmem:[%s6360_s5 + $0xd8] sm:$0xff] }
 0x259   : > { %3750 = vmatprep.subr.bf16.mxu0 %v5910_v0  ;;  %4094 = vmatprep.subr.bf16.mxu1 %v5913_v1  ;;  %v5014_v0 = vpack.c.bf16 %v4144_v61, %v4143_v60  ;;  %v5016_v1 = vpack.c.bf16 %v4162_v63, %v4161_v62 }
 0x25c   : > { %3751 = vmatpush1.bf16.msra.mxu0 %v5908_v2  ;;  %4095 = vmatpush1.bf16.msra.mxu1 %v5911_v3  ;;  %v4145_v2 = vld [vmem:[%s6360_s5 + $0x50] sm:$0xff]  ;;  %v4146_v3 = vld [vmem:[%s6360_s5 + $0x58] sm:$0xff] }
 0x25d   : > { %3752 = vmatprep.subr.bf16.mxu0 %v5916_v4  ;;  %4096 = vmatprep.subr.bf16.mxu1 %v5919_v5  ;;  %v4163_v4 = vld [vmem:[%s6360_s5 + $0xe0] sm:$0xff]  ;;  %v4164_v5 = vld [vmem:[%s6360_s5 + $0xe8] sm:$0xff] }
 0x260   : > { %3753 = vmatpush1.bf16.msra.mxu0 %v5914_v6  ;;  %4097 = vmatpush1.bf16.msra.mxu1 %v5917_v7  ;;  %v5018_v6 = vpack.c.bf16 %v4146_v3, %v4145_v2  ;;  %v5020_v7 = vpack.c.bf16 %v4164_v5, %v4163_v4 }
 0x261   : > { %3754 = vmatprep.subr.bf16.mxu0 %v5922_v8  ;;  %4098 = vmatprep.subr.bf16.mxu1 %v5925_v9  ;;  %v4147_v8 = vld [vmem:[%s6360_s5 + $0x60] sm:$0xff]  ;;  %v4148_v9 = vld [vmem:[%s6360_s5 + $0x68] sm:$0xff] }
 0x264   : > { %3755 = vmatpush1.bf16.msra.mxu0 %v5920_v10  ;;  %4099 = vmatpush1.bf16.msra.mxu1 %v5923_v11  ;;  %v5022_v10 = vpack.c.bf16 %v4148_v9, %v4147_v8  ;;  %v4165_v11 = vld [vmem:[%s6360_s5 + $0xf0] sm:$0xff] }
 0x265   : > { %3756 = vmatprep.subr.bf16.mxu0 %v5928_v12  ;;  %4100 = vmatprep.subr.bf16.mxu1 %v5931_v13  ;;  %v4166_v12 = vld [vmem:[%s6360_s5 + $0xf8] sm:$0xff] }
 0x266   : > { %v5024_v13 = vpack.c.bf16 %v4166_v12, %v4165_v11 }
 0x268   : > { %3757 = vmatpush1.bf16.msra.mxu0 %v5926_v14  ;;  %4101 = vmatpush1.bf16.msra.mxu1 %v5929_v17  ;;  %v4149_v14 = vld [vmem:[%s6360_s5 + $0x70] sm:$0xff]  ;;  %v4150_v17 = vld [vmem:[%s6360_s5 + $0x78] sm:$0xff] }
 0x269   : > { %3758 = vmatprep.subr.bf16.mxu0 %v5934_v18  ;;  %4102 = vmatprep.subr.bf16.mxu1 %v5937_v21  ;;  %v5026_v18 = vpack.c.bf16 %v4150_v17, %v4149_v14 }
 0x26c   : > { %3759 = vmatpush1.bf16.msra.mxu0 %v5932_v23  ;;  %4103 = vmatpush1.bf16.msra.mxu1 %v5935_v16 }
 0x26d   : > { %3760 = vmatprep.subr.bf16.mxu0 %v5940_v24  ;;  %4104 = vmatprep.subr.bf16.mxu1 %v5943_v25 }
 0x270   : > { %3761 = vmatpush1.bf16.msra.mxu0 %v5938_v19  ;;  %4105 = vmatpush1.bf16.msra.mxu1 %v5941_v20 }
 0x271   : > { %3762 = vmatprep.subr.bf16.mxu0 %v5946_v28  ;;  %4106 = vmatprep.subr.bf16.mxu1 %v5949_v29 }
 0x274   : > { %3763 = vmatpush1.bf16.msra.mxu0 %v5944_v30  ;;  %4107 = vmatpush1.bf16.msra.mxu1 %v5947_v15 }
 0x275   : > { %3764 = vmatprep.subr.bf16.mxu0 %v5952_v32  ;;  %4108 = vmatprep.subr.bf16.mxu1 %v5955_v33 }
 0x278   : > { %3765 = vmatpush1.bf16.msra.mxu0 %v5950_v36  ;;  %4109 = vmatpush1.bf16.msra.mxu1 %v5953_v37 }
 0x279   : > { %4997 = vmatprep.subr.bf16.mxu0 %v4996_v38  ;;  %5028 = vmatprep.subr.bf16.mxu1 %v4996_v38 }
 0x27b   : > { %3767 = vmatmul.mubr.bf16.vlgmr.msra.gmra.mrb[0].mxu0 %v4437_v41  ;;  %4111 = vmatmul.mubr.bf16.vlgmr.msra.gmra.mrb[0].mxu1 %v4437_v41 }
 0x27c   : > { %4999 = vmatpush3.bf16.msra.mxu0 %v4998_v42  ;;  %5036 = vmatpush3.bf16.msra.mxu1 %v4998_v42 }
 0x27d   : > { %5001 = vmatprep.subr.bf16.mxu0 %v5000_v43  ;;  %5029 = vmatprep.subr.bf16.mxu1 %v5000_v43 }
 0x280   : > { %5003 = vmatpush3.bf16.msra.mxu0 %v5002_v26  ;;  %5037 = vmatpush3.bf16.msra.mxu1 %v5002_v26 }
 0x281   : > { %5005 = vmatprep.subr.bf16.mxu0 %v5004_v27  ;;  %5030 = vmatprep.subr.bf16.mxu1 %v5004_v27 }
 0x284   : > { %5007 = vmatpush3.bf16.msra.mxu0 %v5006_v52  ;;  %5038 = vmatpush3.bf16.msra.mxu1 %v5006_v52 }
 0x285   : > { %5009 = vmatprep.subr.bf16.mxu0 %v5008_v53  ;;  %5031 = vmatprep.subr.bf16.mxu1 %v5008_v53 }
 0x288   : > { %5011 = vmatpush3.bf16.msra.mxu0 %v5010_v58  ;;  %5039 = vmatpush3.bf16.msra.mxu1 %v5010_v58 }
 0x289   : > { %5013 = vmatprep.subr.bf16.mxu0 %v5012_v59  ;;  %5032 = vmatprep.subr.bf16.mxu1 %v5012_v59 }
 0x28c   : > { %5015 = vmatpush3.bf16.msra.mxu0 %v5014_v0  ;;  %5040 = vmatpush3.bf16.msra.mxu1 %v5014_v0 }
 0x28d   : > { %5017 = vmatprep.subr.bf16.mxu0 %v5016_v1  ;;  %5033 = vmatprep.subr.bf16.mxu1 %v5016_v1 }
 0x290   : > { %5019 = vmatpush3.bf16.msra.mxu0 %v5018_v6  ;;  %5041 = vmatpush3.bf16.msra.mxu1 %v5018_v6 }
 0x291   : > { %5021 = vmatprep.subr.bf16.mxu0 %v5020_v7  ;;  %5034 = vmatprep.subr.bf16.mxu1 %v5020_v7 }
 0x294   : > { %5023 = vmatpush3.bf16.msra.mxu0 %v5022_v10  ;;  %5042 = vmatpush3.bf16.msra.mxu1 %v5022_v10 }
 0x295   : > { %5025 = vmatprep.subr.bf16.mxu0 %v5024_v13  ;;  %5035 = vmatprep.subr.bf16.mxu1 %v5024_v13 }
 0x298   : > { %5027 = vmatpush3.bf16.msra.mxu0 %v5026_v18  ;;  %5043 = vmatpush3.bf16.msra.mxu1 %v5026_v18 }
 0x34e   : > { %v3768_v21 = vpop.f32.mrb[0].mxu0  ;;  %v4112_v23 = vpop.f32.mrb[0].mxu1 }
 0x34f   : > { %v4121_v16 = vmul.f32 %v3768_v21, %v3768_v21  ;;  %v4125_v24 = vmul.f32 %v4112_v23, %v4112_v23  ;;  %v3770_v25 = vpop.f32.mrb[1].mxu0  ;;  %v4114_v19 = vpop.f32.mrb[1].mxu1 }
 0x350   : > { %v4122_v20 = vmul.f32 %v3770_v25, %v3770_v25  ;;  %v4126_v28 = vmul.f32 %v4114_v19, %v4114_v19  ;;  %v3772_v29 = vpop.f32.mrb[2].mxu0  ;;  %v4116_v30 = vpop.f32.mrb[2].mxu1 }
 0x351   : > { %v4129_v15 = vadd.f32 %v4125_v24, %v4121_v16  ;;  %v4123_v32 = vmul.f32 %v3772_v29, %v3772_v29  ;;  %v4127_v33 = vmul.f32 %v4116_v30, %v4116_v30  ;;  %v3774_v34 = vpop.f32.mrb[3].mxu0  ;;  %v4118_v35 = vpop.f32.mrb[3].mxu1 }
 0x352   : > { %v4130_v36 = vadd.f32 %v4126_v28, %v4122_v20  ;;  %v4124_v37 = vmul.f32 %v3774_v34, %v3774_v34  ;;  %v4128_v38 = vmul.f32 %v4118_v35, %v4118_v35 }
 0x353   : > { %v4131_v31 = vadd.f32 %v4127_v33, %v4123_v32 }
 0x354   : > { %v4132_v22 = vadd.f32 %v4128_v38, %v4124_v37  ;;  %4231 = vmatprep.mubr.f32.mxu0 %v4130_v36 }
 0x355   : > { %4232 = vmatmul.mubr.f32.vlgmr.msra.gmra.mrb[4].mxu0 %v4129_v15 }
 0x356   : > { %4236 = vmatprep.mubr.f32.mxu1 %v4132_v22 }
 0x357   : > { %4237 = vmatmul.mubr.f32.vlgmr.msra.gmra.mrb[4].mxu1 %v4131_v31 }
 0x428   : > { %v4990_v39 = vpop.f32.mrb[4].mxu0 }
 0x429   : > { %v4991_v41 = vpop.f32.mrb[5].mxu0 }
 0x42a   : > { %v4992_v42 = vadd.f32 %v4991_v41, %v4990_v39  ;;  %v4993_v43 = vpop.f32.mrb[4].mxu1  ;;  %4249 = sbr.rel (%p4951_p0) target bundleno = 1418 (0x58a), region = 52 }
 0x42b   : > { %v4994_v45 = vpop.f32.mrb[5].mxu1 }
 0x42c   : > { %v4242_v46 = vadd.f32 %v4992_v42, %v4133_v40  ;;  %v4995_v47 = vadd.f32 %v4994_v45, %v4993_v43 }
 0x42e   : > { %4244 = vst [vmem:[#allocation8] sm:$0xff] %v4242_v46  ;;  %v4243_v26 = vadd.f32 %v4995_v47, %v4134_v44 }
 0x430   : > { %4245 = vst [vmem:[#allocation8 + $0x8] sm:$0xff] %v4243_v26 }
 0x435   : > { %v4250_v27 = vld [vmem:[#allocation8] sm:$0xff] }
 0x436   : > { %5956 = vlog2.f32 %v4250_v27 }
 0x437   : > { %v4251_v48 = vld [vmem:[#allocation8 + $0x8] sm:$0xff] }
 0x438   : > { %5958 = vlog2.f32 %v4251_v48 }
 0x440   : > { %v5957_v51 = vpop.eup %5956 }
 0x441   : > { %v4253_v53 = vmul.f32 0.6931472, %v5957_v51 }
 0x442   : > { %v5959_v52 = vpop.eup %5958 }
 0x443   : > { %v4255_v54 = vmul.f32 0.6931472, %v5959_v52  ;;  %v4259_v55 = vsel %vm4258_vm0, %v4253_v53, 0.0 }
 0x444   : > { %4261 = vadd.xlane.f32.xlu0 %v4259_v55 }
 0x445   : > { %v4260_v56 = vsel %vm4258_vm0, %v4255_v54, 0.0 }
 0x448   : > { %4263 = vadd.xlane.f32.xlu0 %v4260_v56 }
 0x4d1   : > { %v4262_v57 = vpop.xlane.xlu0 %4261 }
 0x4d2   : > { %v4266_v58 = vmul.f32 0.0125, %v4262_v57 }
 0x4d4   : > { %v4268_v59 = vsub.f32 %v4253_v53, %v4266_v58 }
 0x4d5   : > { %v4264_v60 = vpop.xlane.xlu0 %4263 }
 0x4d6   : > { %v4267_v61 = vmul.f32 0.0125, %v4264_v60  ;;  %v4270_v62 = vsel %vm4258_vm0, %v4268_v59, 0.0 }
 0x4d7   : > { %v4272_v63 = vmul.f32 %v4270_v62, %v4270_v62 }
 0x4d8   : > { %v4269_v0 = vsub.f32 %v4255_v54, %v4267_v61 }
 0x4d9   : > { %4274 = vadd.xlane.f32.xlu1 %v4272_v63 }
 0x4da   : > { %v4271_v1 = vsel %vm4258_vm0, %v4269_v0, 0.0 }
 0x4db   : > { %v4273_v2 = vmul.f32 %v4271_v1, %v4271_v1 }
 0x4dd   : > { %4276 = vadd.xlane.f32.xlu1 %v4273_v2 }
 0x566   : > { %v4275_v3 = vpop.xlane.xlu1 %4274 }
 0x567   : > { %v4279_v4 = vmul.f32 0.012658228, %v4275_v3 }
 0x569   : > { %5960 = vrsqrt.f32 %v4279_v4  ;;  %vm4283_vm1 = vcmp.eq.f32.partialorder %v4279_v4, inf  ;;  %v4286_v9 = vand.u32 2147483648, %v4279_v4  ;;  %vm4285_vm2 = vcmp.eq.f32.partialorder %v4279_v4, 0.0 }
 0x56a   : > { %v4277_v5 = vpop.xlane.xlu1 %4276 }
 0x56b   : > { %v4280_v6 = vmul.f32 0.012658228, %v4277_v5 }
 0x56d   : > { %5962 = vrsqrt.f32 %v4280_v6  ;;  %vm4290_vm3 = vcmp.eq.f32.partialorder %v4280_v6, inf  ;;  %v4293_v14 = vand.u32 2147483648, %v4280_v6  ;;  %vm4292_vm4 = vcmp.eq.f32.partialorder %v4280_v6, 0.0 }
 0x573   : > { %v5961_v7 = vpop.eup %5960 }
 0x574   : > { %v4282_v8 = vmul.f32 %v5961_v7, %v4279_v4 }
 0x576   : > { %v4284_v10 = vsel %vm4283_vm1, %v4279_v4, %v4282_v8 }
 0x577   : > { %v5963_v11 = vpop.eup %5962  ;;  %v4287_v12 = vsel %vm4285_vm2, %v4286_v9, %v4284_v10 }
 0x578   : > { %5964 = vrcp.f32 %v4287_v12  ;;  %v4289_v13 = vmul.f32 %v5963_v11, %v4280_v6 }
 0x57a   : > { %v4291_v17 = vsel %vm4290_vm3, %v4280_v6, %v4289_v13 }
 0x57b   : > { %v4294_v18 = vsel %vm4292_vm4, %v4293_v14, %v4291_v17 }
 0x57c   : > { %5966 = vrcp.f32 %v4294_v18 }
 0x582   : > { %v5965_v21 = vpop.eup %5964 }
 0x583   : > { %v4296_v23 = vmul.f32 %v5965_v21, %v4268_v59 }
 0x585   : > { %4299 = vst [vmem:[#allocation8] sm:$0xff] %v4296_v23 }
 0x586   : > { %v5967_v16 = vpop.eup %5966 }
 0x587   : > { %v4298_v24 = vmul.f32 %v5967_v16, %v4269_v0 }
 0x589   : > { %4300 = vst [vmem:[#allocation8 + $0x8] sm:$0xff] %v4298_v24 }
 0x58a PF: > { %p5126_p5 = scmp.eq.s32.totalorder %s6264_s30, 2  ;;  %s6153_s15 = smov [#allocation8]  }
 0x58b   : > { %s4310_s6 = sshll.u32 %s6153_s15, 4  ;;  %s4311_s6 = int_to_ptr.vmem [resolvable:$true] %s4310_s6 }
 0x58c   : > { %s6056_s7 = scalar_lea.vmem %s4311_s6, 256  ;;  %p6063_p8 = scmp.lt.s32.totalorder %s4311_s6, %s4311_s6 }
 0x58d   : > { %p6057_p1 = scmp.ne.s32.totalorder %s4311_s6, %s6056_s7  ;;  %p6064_p13 = scmp.lt.s32.totalorder %s6056_s7, %s6056_s7 }
 0x58f   : > { %p6058_p4 = pnand %p6057_p1, %p5126_p5  ;;  %p6065_p2 = por %p6064_p13, %p6063_p8 }
 0x591   : > { %p6059_p7 = pneg %p6058_p4 }
 0x593   : > { %p6066_p3 = pnand %p6065_p2, %p6059_p7 }
 0x595   : > { %6069 = shalt.err (!%p6066_p3)
}
 0x596   : > { %s6070_s28 = scalar_lea.hbm %s7012_s3, 256 }
 0x597   : > { %p6071_p6 = scmp.ne.s32.totalorder %s7012_s3, %s6070_s28  ;;  %p6076_p10 = scmp.lt.u32.totalorder %s6070_s28, %s7012_s3 }
 0x599   : > { %p6072_p11 = pnand %p6071_p6, %p5126_p5 }
 0x59b   : > { %p6073_p12 = pneg %p6072_p11 }
 0x59d   : > { %p6078_p9 = pnand %p6076_p10, %p6073_p12 }
 0x59f   : > { %6081 = shalt.err (!%p6078_p9)
}
 0x5a0   : > { %s6154_s8 = smov 128   ;;  %s6155_s11 = smov 8  }
 0x5a1   : > { %5109 = dma.vmem_to_hbm [thread:$0]  (%p5126_p5), %s4311_s6, 256, %s7012_s3, [#allocation4], %s6154_s8, %s6154_s8, %s6155_s11  }
 0x5a2   : > { %6115 = dma.done.wait (%p5126_p5), [#allocation4], 256  }
 0x5a3   : > { %6117 = vsyncadd (%p5126_p5), [#allocation4], 4294967040 }
 0x5a4 PF: > { %s18_s17 = sadd.s32 1, %s6140_s17   ;;  %s7030_s12 = smov %s6124_s13 }
 0x5a5   : > { %p15_p0 = scmp.ge.s32.totalorder %s18_s17, 5   ;;  %s7031_s13 = smov %s6128_s14 }
 0x5a6   : > { %s7032_s14 = smov %s6220_s24  ;;  %s7033_s15 = smov %s6136_s16 }
 0x5a7   : > { %s7034_s16 = smov %s7036_s18  ;;  %17 = sbr.rel (!%p15_p0) target bundleno = 6 (0x6), region = 95 }
 0x5ae   :  { %4326 = vsyncpa [#allocation3], 1 }
 0x5af   :  { %4328 = vsyncpa [#allocation3 + $0x1], 1 }
 0x5b0   :  { %4329 = vsyncpa [#allocation6], 1 }
 0x5b1   :  { %4331 = vsyncpa [#allocation6 + $0x1], 1 }
 0x5b2   :  { %4332 = vsyncpa [#allocation4], 1 }
 0x5b3   :  { %4334 = vsyncpa [#allocation4 + $0x1], 1 }

</bundles_post_ra>
